<compile_context>
chip_gen: v7x
topology: tpu7x:2x2x1
jax: 0.10.0
libtpu: 0.0.40
codegen_flags: <defaults>
</compile_context>

<pallas_src>
import functools

import numpy as np
import jax
import jax.numpy as jnp
from jax import lax
from jax.experimental import pallas as pl
from jax.experimental.pallas import tpu as pltpu


# ----------------------------- in-kernel helpers -----------------------------

def _sq_cdist(a, b, b_sq_row):
    """Squared Euclidean distances: a [M, d], b [K, d], b_sq_row [1, K] -> [M, K]."""
    a_sq = jnp.sum(a * a, axis=1, keepdims=True)                      # [M, 1]
    ab = lax.dot_general(a, b, (((1,), (1,)), ((), ())),
                         preferred_element_type=jnp.float32)           # [M, K]
    return jnp.maximum(a_sq + b_sq_row - 2.0 * ab, 0.0)


def _softmax_lastdim(logits):
    m = jnp.max(logits, axis=1, keepdims=True)
    e = jnp.exp(logits - m)
    # divide -> EUP reciprocal (approx); denominator error ~1e-4 relative.
    return e * pl.reciprocal(jnp.sum(e, axis=1, keepdims=True), approx=True)


# ------------------------------- fused kernel --------------------------------

def _loss_kernel(fcat_ref, flab_ref, clus_ref, lab_row_ref, valid_col_ref, out_ref,
                 *, sigma_xy, sigma_cnn, num_label_classes, xy_dim):
    inv_xy = np.float32(1.0 / (np.sqrt(2.0) * sigma_xy))
    inv_cnn = np.float32(1.0 / (np.sqrt(2.0) * sigma_cnn))

    clus = clus_ref[...]                                               # [K, D]
    k, d = clus.shape

    # per-column scale so that ||scaled diff||^2 = dxy/(2*sxy^2) + dcnn/(2*scnn^2)
    col = lax.broadcasted_iota(jnp.int32, (1, d), 1)
    scale_row = jnp.where(col < xy_dim, inv_xy, inv_cnn)               # [1, D]
    clus_s = clus * scale_row                                          # [K, D]
    clus_sq = jnp.sum(clus * clus, axis=1)[None, :]                    # [1, K]
    clus_s_sq = jnp.sum(clus_s * clus_s, axis=1)[None, :]              # [1, K]

    # ---------------- distortion loss (random pixel subset) ----------------
    fcat = fcat_ref[...]                                               # [P, D]
    dist_sq_cat = _sq_cdist(fcat, clus, clus_sq)                       # [P, K]
    soft = _softmax_lastdim(-_sq_cdist(fcat * scale_row, clus_s, clus_s_sq))
    p = fcat.shape[0]
    out_ref[0] = jnp.sum(soft * dist_sq_cat) * np.float32(1.0 / (p * k))

    # ---------------- conflict loss (labelled pixels, group-sum identity) ----------------
    flab = flab_ref[...]                                               # [N, D]
    valid = valid_col_ref[...]                                         # [N, 1]
    soft_lab = _softmax_lastdim(
        -_sq_cdist(flab * scale_row, clus_s, clus_s_sq)) * valid       # [N, K] masked

    lab_row = lab_row_ref[...]                                         # [1, N]
    cls = lax.broadcasted_iota(jnp.int32, (num_label_classes, 1), 0).astype(jnp.float32)
    onehot = (lab_row == cls).astype(jnp.float32)                      # [L, N]
    g = lax.dot_general(onehot, soft_lab, (((1,), (0,)), ((), ())),
                        preferred_element_type=jnp.float32)            # [L, K]
    s_all = jnp.sum(g, axis=0, keepdims=True)                          # [1, K]
    total = jnp.sum(s_all * s_all) - jnp.sum(g * g)                    # sum over conflicting pairs
    m = jnp.sum(valid)
    # guard m == 0 (image with no labelled pixels): total is 0 then as well.
    out_ref[1] = total / jnp.maximum(m * m, 1.0)


# --------------------------------- wrapper -----------------------------------

def custom_loss_forward(clusters, XY_features, CNN_features, features_cat, labels,
                        indexes, *, sigma_val_xy=0.5, sigma_val_cnn=0.5, alpha=1.0,
                        num_label_classes=None):
    B, K, D = clusters.shape
    assert B == 1, "PyTorch module broadcasting requires B == 1"
    _, N, _ = features_cat.shape

    if num_label_classes is None:
        # labels are an integer class map; the group-sum identity needs a static bound.
        num_label_classes = int(jax.device_get(jnp.max(labels))) + 1

    clus = clusters[0].astype(jnp.float32)                             # [K, D]

    # --- distortion inputs (random subset of pixels) ---
    # TODO(synk): for large num_pixels_used move this gather in-kernel with
    # PrefetchScalarGridSpec(num_scalar_prefetch=1) + pl.Element row BlockSpecs.
    fcat_sel = features_cat[0][indexes].astype(jnp.float32)            # [P, D]

    # --- conflict inputs (labelled pixels; filtering done via masking) ---
    labels_reshape = jnp.transpose(labels, (0, 2, 3, 1)).astype(jnp.float32)  # [B,H,W,1]
    loc = (labels_reshape > 0).astype(jnp.float32).reshape(B, N, 1)
    xy_lab = (XY_features * loc)[0].astype(jnp.float32)                # [N, 2]
    valid_col = (jnp.sum(jnp.abs(xy_lab), axis=1, keepdims=True) > 0).astype(jnp.float32)
    f_lab = jnp.concatenate([XY_features[0], CNN_features[0]],
                            axis=-1).astype(jnp.float32)               # [N, D]
    lab_row = labels_reshape.reshape(B, 1, N)[0]                       # [1, N]

    vmem = pl.BlockSpec(memory_space=pltpu.MemorySpace.VMEM)
    out = pl.pallas_call(
        functools.partial(_loss_kernel,
                          sigma_xy=sigma_val_xy, sigma_cnn=sigma_val_cnn,
                          num_label_classes=num_label_classes, xy_dim=2),
        out_shape=jax.ShapeDtypeStruct((2,), jnp.float32),
        in_specs=[vmem] * 5,
        out_specs=pl.BlockSpec(memory_space=pltpu.MemorySpace.SMEM),
    )(fcat_sel, f_lab, clus, lab_row, valid_col)

    distortion = out[0]
    conflict = out[1]
    return distortion + alpha * conflict, distortion, alpha * conflict


# ------------------------------ numpy reference -------------------------------

def _reference(clusters, XY, CNN, features_cat, labels, indexes,
               sigma_xy, sigma_cnn, alpha):
    c = np.asarray(clusters)[0]
    xy = np.asarray(XY)[0]
    cnn = np.asarray(CNN)[0]
    fcat = np.asarray(features_cat)[0]
    lab = np.asarray(labels)
    idx = np.asarray(indexes)

    def sqd(a, b):
        return np.linalg.norm(a[:, None, :] - b[None, :, :], axis=-1) ** 2

    dcat = sqd(fcat[idx], c)
    dxy = sqd(xy[idx], c[:, :2])
    dcnn = sqd(cnn[idx], c[:, 2:])
    logit = -dxy / (2 * sigma_xy ** 2) - dcnn / (2 * sigma_cnn ** 2)
    e = np.exp(logit - logit.max(-1, keepdims=True))
    s = e / e.sum(-1, keepdims=True)
    distortion = (s * dcat).mean()

    lab_r = np.transpose(lab, (0, 2, 3, 1)).astype(np.float32).reshape(-1, 1)  # [N,1]
    loc = (lab_r > 0).astype(np.float32)
    xy_l = xy * loc
    cnn_l = cnn * loc
    mask = np.abs(xy_l).sum(1) > 0
    xy_f, cnn_f, lab_f = xy_l[mask], cnn_l[mask], lab_r[mask]
    dxy = sqd(xy_f, c[:, :2])
    dcnn = sqd(cnn_f, c[:, 2:])
    logit = -dxy / (2 * sigma_xy ** 2) - dcnn / (2 * sigma_cnn ** 2)
    e = np.exp(logit - logit.max(-1, keepdims=True))
    s = e / e.sum(-1, keepdims=True)
    inner = s @ s.T                                  # direct N x N path (validates identity)
    conf = (lab_f != lab_f.T).astype(np.float32)
    conflict = (inner * conf).mean()
    return distortion + alpha * conflict, distortion, alpha * conflict


# ----------------------------------- main -------------------------------------

if __name__ == "__main__":
    key = jax.random.PRNGKey(0)
    k_cnn, k_clus, k_lab, k_perm = jax.random.split(key, 4)

    B, H, W = 1, 16, 16
    N = H * W
    CNN_dim = 6
    D = 2 + CNN_dim
    K = 8
    num_pixels_used = 128
    num_label_classes = 4
    sigma_xy, sigma_cnn, alpha = 0.5, 0.5, 1.0

    ys, xs = jnp.meshgrid(jnp.arange(H), jnp.arange(W), indexing="ij")
    XY_features = jnp.stack([xs.reshape(-1) / W, ys.reshape(-1) / H],
                            axis=-1).astype(jnp.float32)[None]                 # (1, N, 2)
    CNN_features = jax.random.normal(k_cnn, (B, N, CNN_dim), dtype=jnp.float32)
    features_cat = jnp.concatenate([XY_features, CNN_features], axis=-1)       # (1, N, D)
    clusters = jax.random.normal(k_clus, (B, K, D), dtype=jnp.float32)
    labels = jax.random.randint(k_lab, (B, 1, H, W), 0,
                                num_label_classes).astype(jnp.int32)           # NCHW

    # deterministic stand-in for torch.randperm(N)[:num_pixels_used]
    indexes = jax.random.permutation(k_perm, N)[:num_pixels_used]

    total, dist_l, conf_l = custom_loss_forward(
        clusters, XY_features, CNN_features, features_cat, labels, indexes,
        sigma_val_xy=sigma_xy, sigma_val_cnn=sigma_cnn, alpha=alpha,
        num_label_classes=num_label_classes)
    jax.block_until_ready((total, dist_l, conf_l))

    ref_total, ref_dist, ref_conf = _reference(
        clusters, XY_features, CNN_features, features_cat, labels, indexes,
        sigma_xy, sigma_cnn, alpha)

    # tolerance covers the EUP approximate-reciprocal softmax (approx=True).
    np.testing.assert_allclose(float(dist_l), ref_dist, rtol=5e-3, atol=1e-3)
    np.testing.assert_allclose(float(conf_l), ref_conf, rtol=5e-3, atol=1e-3)
    np.testing.assert_allclose(float(total), ref_total, rtol=5e-3, atol=1e-3)

    print("KERNEL_OK")
</pallas_src>

<mosaic_0001>
module attributes {stable_mosaic.version = 11 : i64} {
  func.func @_loss_kernel(%arg0: memref<128x8xf32, #tpu.memory_space<vmem>>, %arg1: memref<256x8xf32, #tpu.memory_space<vmem>>, %arg2: memref<8x8xf32, #tpu.memory_space<vmem>>, %arg3: memref<1x256xf32, #tpu.memory_space<vmem>>, %arg4: memref<256x1xf32, #tpu.memory_space<vmem>>, %arg5: memref<2xf32, #tpu.memory_space<smem>>) attributes {dimension_semantics = [], scalar_prefetch = 0 : i64, scratch_operands = 0 : i64, tpu.core_type = #tpu.core_type<tc>} {
    %c0 = arith.constant 0 : index
    %c0_0 = arith.constant 0 : index
    %0 = vector.load %arg2[%c0, %c0_0] : memref<8x8xf32, #tpu.memory_space<vmem>>, vector<8x8xf32>
    %1 = tpu.iota {dimensions = array<i32: 1>} : vector<1x8xi32>
    %c2_i32 = arith.constant 2 : i32
    %2 = vector.broadcast %c2_i32 : i32 to vector<1x8xi32>
    %3 = arith.cmpi slt, %1, %2 : vector<1x8xi32>
    %cst = arith.constant 1.41421354 : f32
    %cst_1 = arith.constant 1.41421354 : f32
    %4 = vector.broadcast %cst : f32 to vector<1x8xf32>
    %5 = vector.broadcast %cst_1 : f32 to vector<1x8xf32>
    %6 = arith.select %3, %4, %5 : vector<1x8xi1>, vector<1x8xf32>
    %7 = vector.broadcast %6 : vector<1x8xf32> to vector<8x8xf32>
    %8 = arith.mulf %0, %7 : vector<8x8xf32>
    %9 = arith.mulf %0, %0 : vector<8x8xf32>
    %cst_2 = arith.constant dense<0.000000e+00> : vector<8xf32>
    %10 = vector.multi_reduction <add>, %9, %cst_2 [1] : vector<8x8xf32> to vector<8xf32>
    %11 = vector.shape_cast %10 : vector<8xf32> to vector<1x8xf32>
    %12 = arith.mulf %8, %8 : vector<8x8xf32>
    %cst_3 = arith.constant dense<0.000000e+00> : vector<8xf32>
    %13 = vector.multi_reduction <add>, %12, %cst_3 [1] : vector<8x8xf32> to vector<8xf32>
    %14 = vector.shape_cast %13 : vector<8xf32> to vector<1x8xf32>
    %c0_4 = arith.constant 0 : index
    %c0_5 = arith.constant 0 : index
    %15 = vector.load %arg0[%c0_4, %c0_5] : memref<128x8xf32, #tpu.memory_space<vmem>>, vector<128x8xf32>
    %16 = arith.mulf %15, %15 : vector<128x8xf32>
    %cst_6 = arith.constant dense<0.000000e+00> : vector<128xf32>
    %17 = vector.multi_reduction <add>, %16, %cst_6 [1] : vector<128x8xf32> to vector<128xf32>
    %18 = vector.shape_cast %17 : vector<128xf32> to vector<128x1xf32>
    %cst_7 = arith.constant dense<0.000000e+00> : vector<128x8xf32>
    %19 = tpu.matmul %15, %0, %cst_7 {dimension_numbers = #tpu.dot_dimension_numbers<[1], [1], [0], [0], [0, 0, 1, 0], [], []>} : vector<128x8xf32>, vector<8x8xf32>, vector<128x8xf32> -> vector<128x8xf32>
    %20 = vector.broadcast %18 : vector<128x1xf32> to vector<128x8xf32>
    %21 = vector.broadcast %11 : vector<1x8xf32> to vector<128x8xf32>
    %22 = arith.addf %20, %21 : vector<128x8xf32>
    %cst_8 = arith.constant 2.000000e+00 : f32
    %23 = vector.broadcast %cst_8 : f32 to vector<128x8xf32>
    %24 = arith.mulf %23, %19 : vector<128x8xf32>
    %25 = arith.subf %22, %24 : vector<128x8xf32>
    %cst_9 = arith.constant 0.000000e+00 : f32
    %26 = vector.broadcast %cst_9 : f32 to vector<128x8xf32>
    %27 = arith.maximumf %25, %26 : vector<128x8xf32>
    %28 = vector.broadcast %6 : vector<1x8xf32> to vector<128x8xf32>
    %29 = arith.mulf %15, %28 : vector<128x8xf32>
    %30 = arith.mulf %29, %29 : vector<128x8xf32>
    %cst_10 = arith.constant dense<0.000000e+00> : vector<128xf32>
    %31 = vector.multi_reduction <add>, %30, %cst_10 [1] : vector<128x8xf32> to vector<128xf32>
    %32 = vector.shape_cast %31 : vector<128xf32> to vector<128x1xf32>
    %cst_11 = arith.constant dense<0.000000e+00> : vector<128x8xf32>
    %33 = tpu.matmul %29, %8, %cst_11 {dimension_numbers = #tpu.dot_dimension_numbers<[1], [1], [0], [0], [0, 0, 1, 0], [], []>} : vector<128x8xf32>, vector<8x8xf32>, vector<128x8xf32> -> vector<128x8xf32>
    %34 = vector.broadcast %32 : vector<128x1xf32> to vector<128x8xf32>
    %35 = vector.broadcast %14 : vector<1x8xf32> to vector<128x8xf32>
    %36 = arith.addf %34, %35 : vector<128x8xf32>
    %cst_12 = arith.constant 2.000000e+00 : f32
    %37 = vector.broadcast %cst_12 : f32 to vector<128x8xf32>
    %38 = arith.mulf %37, %33 : vector<128x8xf32>
    %39 = arith.subf %36, %38 : vector<128x8xf32>
    %cst_13 = arith.constant 0.000000e+00 : f32
    %40 = vector.broadcast %cst_13 : f32 to vector<128x8xf32>
    %41 = arith.maximumf %39, %40 : vector<128x8xf32>
    %cst_14 = arith.constant 0.000000e+00 : f32
    %42 = vector.broadcast %cst_14 : f32 to vector<128x8xf32>
    %43 = arith.subf %42, %41 : vector<128x8xf32>
    %cst_15 = arith.constant dense<0xFF800000> : vector<128xf32>
    %44 = vector.multi_reduction <maximumf>, %43, %cst_15 [1] : vector<128x8xf32> to vector<128xf32>
    %45 = vector.shape_cast %44 : vector<128xf32> to vector<128x1xf32>
    %46 = vector.broadcast %45 : vector<128x1xf32> to vector<128x8xf32>
    %47 = arith.subf %43, %46 : vector<128x8xf32>
    %48 = math.exp %47 : vector<128x8xf32>
    %cst_16 = arith.constant dense<0.000000e+00> : vector<128xf32>
    %49 = vector.multi_reduction <add>, %48, %cst_16 [1] : vector<128x8xf32> to vector<128xf32>
    %50 = vector.shape_cast %49 : vector<128xf32> to vector<128x1xf32>
    %51 = tpu.reciprocal %50 {approx = true} : vector<128x1xf32> -> vector<128x1xf32>
    %52 = vector.broadcast %51 : vector<128x1xf32> to vector<128x8xf32>
    %53 = arith.mulf %48, %52 : vector<128x8xf32>
    %54 = arith.mulf %53, %27 : vector<128x8xf32>
    %55 = vector.shape_cast %54 : vector<128x8xf32> to vector<1x128x8xf32>
    %cst_17 = arith.constant dense<0.000000e+00> : vector<1xf32>
    %56 = vector.multi_reduction <add>, %55, %cst_17 [1, 2] : vector<1x128x8xf32> to vector<1xf32>
    %57 = vector.shape_cast %56 : vector<1xf32> to vector<1x1x1xf32>
    %58 = vector.extract %57[0, 0, 0] : f32 from vector<1x1x1xf32>
    %cst_18 = arith.constant 9.765625E-4 : f32
    %59 = arith.mulf %58, %cst_18 : f32
    %c0_19 = arith.constant 0 : index
    %60 = memref.load %arg5[%c0_19] : memref<2xf32, #tpu.memory_space<smem>>
    memref.store %59, %arg5[%c0_19] : memref<2xf32, #tpu.memory_space<smem>>
    %c0_20 = arith.constant 0 : index
    %c0_21 = arith.constant 0 : index
    %61 = vector.load %arg1[%c0_20, %c0_21] : memref<256x8xf32, #tpu.memory_space<vmem>>, vector<256x8xf32>
    %c0_22 = arith.constant 0 : index
    %c0_23 = arith.constant 0 : index
    %62 = vector.load %arg4[%c0_22, %c0_23] : memref<256x1xf32, #tpu.memory_space<vmem>>, vector<256x1xf32>
    %63 = vector.broadcast %6 : vector<1x8xf32> to vector<256x8xf32>
    %64 = arith.mulf %61, %63 : vector<256x8xf32>
    %65 = arith.mulf %64, %64 : vector<256x8xf32>
    %cst_24 = arith.constant dense<0.000000e+00> : vector<256xf32>
    %66 = vector.multi_reduction <add>, %65, %cst_24 [1] : vector<256x8xf32> to vector<256xf32>
    %67 = vector.shape_cast %66 : vector<256xf32> to vector<256x1xf32>
    %cst_25 = arith.constant dense<0.000000e+00> : vector<256x8xf32>
    %68 = tpu.matmul %64, %8, %cst_25 {dimension_numbers = #tpu.dot_dimension_numbers<[1], [1], [0], [0], [0, 0, 1, 0], [], []>} : vector<256x8xf32>, vector<8x8xf32>, vector<256x8xf32> -> vector<256x8xf32>
    %69 = vector.broadcast %67 : vector<256x1xf32> to vector<256x8xf32>
    %70 = vector.broadcast %14 : vector<1x8xf32> to vector<256x8xf32>
    %71 = arith.addf %69, %70 : vector<256x8xf32>
    %cst_26 = arith.constant 2.000000e+00 : f32
    %72 = vector.broadcast %cst_26 : f32 to vector<256x8xf32>
    %73 = arith.mulf %72, %68 : vector<256x8xf32>
    %74 = arith.subf %71, %73 : vector<256x8xf32>
    %cst_27 = arith.constant 0.000000e+00 : f32
    %75 = vector.broadcast %cst_27 : f32 to vector<256x8xf32>
    %76 = arith.maximumf %74, %75 : vector<256x8xf32>
    %cst_28 = arith.constant 0.000000e+00 : f32
    %77 = vector.broadcast %cst_28 : f32 to vector<256x8xf32>
    %78 = arith.subf %77, %76 : vector<256x8xf32>
    %cst_29 = arith.constant dense<0xFF800000> : vector<256xf32>
    %79 = vector.multi_reduction <maximumf>, %78, %cst_29 [1] : vector<256x8xf32> to vector<256xf32>
    %80 = vector.shape_cast %79 : vector<256xf32> to vector<256x1xf32>
    %81 = vector.broadcast %80 : vector<256x1xf32> to vector<256x8xf32>
    %82 = arith.subf %78, %81 : vector<256x8xf32>
    %83 = math.exp %82 : vector<256x8xf32>
    %cst_30 = arith.constant dense<0.000000e+00> : vector<256xf32>
    %84 = vector.multi_reduction <add>, %83, %cst_30 [1] : vector<256x8xf32> to vector<256xf32>
    %85 = vector.shape_cast %84 : vector<256xf32> to vector<256x1xf32>
    %86 = tpu.reciprocal %85 {approx = true} : vector<256x1xf32> -> vector<256x1xf32>
    %87 = vector.broadcast %86 : vector<256x1xf32> to vector<256x8xf32>
    %88 = arith.mulf %83, %87 : vector<256x8xf32>
    %89 = vector.broadcast %62 : vector<256x1xf32> to vector<256x8xf32>
    %90 = arith.mulf %88, %89 : vector<256x8xf32>
    %c0_31 = arith.constant 0 : index
    %c0_32 = arith.constant 0 : index
    %91 = vector.load %arg3[%c0_31, %c0_32] : memref<1x256xf32, #tpu.memory_space<vmem>>, vector<1x256xf32>
    %92 = tpu.iota {dimensions = array<i32: 0>} : vector<4x1xi32>
    %93 = arith.sitofp %92 : vector<4x1xi32> to vector<4x1xf32>
    %94 = vector.broadcast %91 : vector<1x256xf32> to vector<4x256xf32>
    %95 = vector.broadcast %93 : vector<4x1xf32> to vector<4x256xf32>
    %96 = arith.cmpf oeq, %94, %95 : vector<4x256xf32>
    %97 = arith.extui %96 : vector<4x256xi1> to vector<4x256xi32>
    %98 = arith.sitofp %97 : vector<4x256xi32> to vector<4x256xf32>
    %cst_33 = arith.constant dense<0.000000e+00> : vector<4x8xf32>
    %99 = tpu.matmul %98, %90, %cst_33 {dimension_numbers = #tpu.dot_dimension_numbers<[1], [0], [0], [1], [0, 0, 1, 1], [], []>} : vector<4x256xf32>, vector<256x8xf32>, vector<4x8xf32> -> vector<4x8xf32>
    %cst_34 = arith.constant dense<0.000000e+00> : vector<8xf32>
    %100 = vector.multi_reduction <add>, %99, %cst_34 [0] : vector<4x8xf32> to vector<8xf32>
    %101 = vector.shape_cast %100 : vector<8xf32> to vector<1x8xf32>
    %102 = arith.mulf %101, %101 : vector<1x8xf32>
    %103 = vector.shape_cast %102 : vector<1x8xf32> to vector<1x1x8xf32>
    %cst_35 = arith.constant dense<0.000000e+00> : vector<1xf32>
    %104 = vector.multi_reduction <add>, %103, %cst_35 [1, 2] : vector<1x1x8xf32> to vector<1xf32>
    %105 = vector.shape_cast %104 : vector<1xf32> to vector<1x1x1xf32>
    %106 = vector.extract %105[0, 0, 0] : f32 from vector<1x1x1xf32>
    %107 = arith.mulf %99, %99 : vector<4x8xf32>
    %108 = vector.shape_cast %107 : vector<4x8xf32> to vector<1x4x8xf32>
    %cst_36 = arith.constant dense<0.000000e+00> : vector<1xf32>
    %109 = vector.multi_reduction <add>, %108, %cst_36 [1, 2] : vector<1x4x8xf32> to vector<1xf32>
    %110 = vector.shape_cast %109 : vector<1xf32> to vector<1x1x1xf32>
    %111 = vector.extract %110[0, 0, 0] : f32 from vector<1x1x1xf32>
    %112 = arith.subf %106, %111 : f32
    %113 = vector.shape_cast %62 : vector<256x1xf32> to vector<1x256x1xf32>
    %cst_37 = arith.constant dense<0.000000e+00> : vector<1xf32>
    %114 = vector.multi_reduction <add>, %113, %cst_37 [1, 2] : vector<1x256x1xf32> to vector<1xf32>
    %115 = vector.shape_cast %114 : vector<1xf32> to vector<1x1x1xf32>
    %116 = vector.extract %115[0, 0, 0] : f32 from vector<1x1x1xf32>
    %117 = arith.mulf %116, %116 : f32
    %cst_38 = arith.constant 1.000000e+00 : f32
    %118 = arith.maximumf %117, %cst_38 : f32
    %119 = arith.divf %112, %118 : f32
    %c1 = arith.constant 1 : index
    %120 = memref.load %arg5[%c1] : memref<2xf32, #tpu.memory_space<smem>>
    memref.store %119, %arg5[%c1] : memref<2xf32, #tpu.memory_space<smem>>
    return
  }
}

</mosaic_0001>

<bundles_post_ra>
// kernel: tpu_custom_call.1
= control target key start
LH: loop header
LB: loop body
LE: loop exit
PB: predicated region body
PF: predicated region fallthrough
CT: control target
= control target key end

     0   :  { %vm24_vm0 = vcmask 64512   ;;  %v3021_v6 = vmov 0   ;;  %vm2367_vm1 = vcmask 7168   ;;  %s4856_s0 = inlined_call_operand.vmem [shape: f32[128,8], index: 0, kind: input, shape index: {}]   ;;  %s4857_s1 = inlined_call_operand.vmem [shape: f32[256,8], index: 1, kind: input, shape index: {}]   ;;  %s4858_s2 = inlined_call_operand.vmem [shape: f32[8,8], index: 2, kind: input, shape index: {}]   ;;  %s4859_s3 = inlined_call_operand.vmem [shape: f32[1,256], index: 3, kind: input, shape index: {}]   ;;  %s4860_s4 = inlined_call_operand.vmem [shape: f32[256,1], index: 4, kind: input, shape index: {}]   ;;  %s4861_s5 = inlined_call_operand.hbm [shape: f32[2], index: 5, kind: output, shape index: {}]  }
   0x1   :  { %v21_v0 = vld [vmem:[%s4858_s2] sm:$0xff]  ;;  %v1012_v2 = vld [vmem:[%s4857_s1 + $0x88] sm:$0xff]  ;;  %2782 = vset.pattern.permute.xlu1 %v3021_v6  ;;  %2783 = vset.pattern.permute.xlu0 %v3021_v6  ;;  %v997_v8 = vld [vmem:[%s4857_s1 + $0x10] sm:$0xff] }
   0x2   :  { %v995_v1 = vld [vmem:[%s4857_s1] sm:$0xff]  ;;  %v3064_v3 = vmul.f32 1.4142135, %v21_v0  ;;  %v3066_v5 = vmul.f32 1.4142135, %v1012_v2  ;;  %v996_v7 = vld [vmem:[%s4857_s1 + $0x8] sm:$0xff]  ;;  %2634 = vmatprep.subr.msk.mxu1 %vm24_vm0, %v21_v0 }
   0x3   :  { %v1059_v4 = vmul.f32 1.4142135, %v995_v1  ;;  %v1011_v9 = vld [vmem:[%s4857_s1 + $0x80] sm:$0xff]  ;;  %v1060_v12 = vmul.f32 1.4142135, %v996_v7  ;;  %v998_v14 = vld [vmem:[%s4857_s1 + $0x18] sm:$0xff]  ;;  %2635 = vmatpush3.xpose.msk.msra.mxu1 %vm24_vm0, %v21_v0 }
   0x4   :  { %2686 = vmatprep.subr.msk.mxu0 %vm24_vm0, %v3064_v3  ;;  %v1108_v10 = vmul.f32 %v3066_v5, %v3066_v5  ;;  %v28_v11 = vmul.f32 %v3064_v3, %v3064_v3  ;;  %v1013_v15 = vld [vmem:[%s4857_s1 + $0x90] sm:$0xff]  ;;  %v1061_v16 = vmul.f32 1.4142135, %v997_v8  ;;  %v3093_v17 = vmul.f32 1.4142135, %v1011_v9  ;;  %v999_v21 = vld [vmem:[%s4857_s1 + $0x20] sm:$0xff]  ;;  %2660 = vmatprep.subr.msk.mxu1 %vm24_vm0, %v3064_v3 }
   0x5   :  { %2688 = vmatprep.mubr.msk.f32.mxu0 %vm24_vm0, %v1059_v4  ;;  %v1091_v13 = vmul.f32 %v1059_v4, %v1059_v4  ;;  %2687 = vmatpush3.xpose.msk.msra.mxu0 %vm24_vm0, %v3064_v3  ;;  %v3098_v20 = vmul.f32 1.4142135, %v1013_v15  ;;  %v1062_v23 = vmul.f32 1.4142135, %v998_v14  ;;  %v1014_v24 = vld [vmem:[%s4857_s1 + $0x98] sm:$0xff]  ;;  %v1092_v27 = vmul.f32 %v1060_v12, %v1060_v12  ;;  %v1000_v28 = vld [vmem:[%s4857_s1 + $0x28] sm:$0xff] }
   0x6   :  { %v1174_v18 = vsel %vm24_vm0, %v1108_v10, 0.0  ;;  %v29_v19 = vsel %vm24_vm0, %v28_v11, 0.0  ;;  %v1107_v22 = vmul.f32 %v3093_v17, %v3093_v17  ;;  %v3117_v29 = vmul.f32 1.4142135, %v1014_v24  ;;  %v1015_v32 = vld [vmem:[%s4857_s1 + $0xa0] sm:$0xff]  ;;  %v1001_v33 = vld [vmem:[%s4857_s1 + $0x30] sm:$0xff] }
   0x7   :  { %1175 = vadd.xlane.f32.xlu1 %v1174_v18  ;;  %30 = vadd.xlane.f32.xlu0 %v29_v19  ;;  %v1123_v25 = vsel %vm24_vm0, %v1091_v13, 0.0  ;;  %v1109_v26 = vmul.f32 %v3098_v20, %v3098_v20  ;;  %v1063_v31 = vmul.f32 1.4142135, %v999_v21  ;;  %v1064_v34 = vmul.f32 1.4142135, %v1000_v28  ;;  %v1002_v39 = vld [vmem:[%s4857_s1 + $0x38] sm:$0xff] }
   0x8   :  { %2689 = vmatmul.mubr.msk.f32.vlgmr.msra.gmra.mrb[0].mxu0 %vm24_vm0, %v1060_v12  ;;  %v1171_v30 = vsel %vm24_vm0, %v1107_v22, 0.0  ;;  %v1093_v35 = vmul.f32 %v1061_v16, %v1061_v16  ;;  %v1126_v37 = vsel %vm24_vm0, %v1092_v27, 0.0  ;;  %v1110_v38 = vmul.f32 %v3117_v29, %v3117_v29  ;;  %v1016_v42 = vld [vmem:[%s4857_s1 + $0xa8] sm:$0xff]  ;;  %v1003_v43 = vld [vmem:[%s4857_s1 + $0x40] sm:$0xff]  ;;  %v1017_v52 = vld [vmem:[%s4857_s1 + $0xb0] sm:$0xff] }
   0x9   :  { %2691 = vmatprep.mubr.msk.f32.mxu0 %vm24_vm0, %v1061_v16  ;;  %v1177_v36 = vsel %vm24_vm0, %v1109_v26, 0.0  ;;  %v3135_v40 = vmul.f32 1.4142135, %v1015_v32  ;;  %v1065_v41 = vmul.f32 1.4142135, %v1001_v33  ;;  %v1094_v48 = vmul.f32 %v1062_v23, %v1062_v23  ;;  %v1004_v49 = vld [vmem:[%s4857_s1 + $0x48] sm:$0xff] }
   0xa   :  { %v1129_v44 = vsel %vm24_vm0, %v1093_v35, 0.0  ;;  %v1066_v45 = vmul.f32 1.4142135, %v1002_v39  ;;  %v1180_v46 = vsel %vm24_vm0, %v1110_v38, 0.0  ;;  %v3152_v50 = vmul.f32 1.4142135, %v1016_v42 }
   0xb   :  { %1124 = vadd.xlane.f32.xlu1 %v1123_v25  ;;  %1172 = vadd.xlane.f32.xlu0 %v1171_v30  ;;  %v1111_v47 = vmul.f32 %v3135_v40, %v3135_v40  ;;  %v3155_v51 = vmul.f32 1.4142135, %v1003_v43  ;;  %v1005_v53 = vld [vmem:[%s4857_s1 + $0x50] sm:$0xff]  ;;  %v3163_v54 = vmul.f32 1.4142135, %v1004_v49  ;;  %v1095_v55 = vmul.f32 %v1063_v31, %v1063_v31  ;;  %v1006_v61 = vld [vmem:[%s4857_s1 + $0x58] sm:$0xff] }
   0xc   :  { %2692 = vmatmul.mubr.msk.f32.gmra.mrb[2].mxu0 %vm24_vm0, %v1062_v23  ;;  %v1132_v57 = vsel %vm24_vm0, %v1094_v48, 0.0  ;;  %v1112_v58 = vmul.f32 %v3152_v50, %v3152_v50  ;;  %v3170_v59 = vmul.f32 1.4142135, %v1017_v52  ;;  %v3174_v60 = vmul.f32 1.4142135, %v1005_v53  ;;  %v1018_v62 = vld [vmem:[%s4857_s1 + $0xb8] sm:$0xff] }
   0xd   :  { %2694 = vmatprep.mubr.msk.f32.mxu0 %vm24_vm0, %v1063_v31  ;;  %v1183_v56 = vsel %vm24_vm0, %v1111_v47, 0.0  ;;  %v1007_v63 = vld [vmem:[%s4857_s1 + $0x60] sm:$0xff]  ;;  %v1135_v0 = vsel %vm24_vm0, %v1095_v55, 0.0  ;;  %v1096_v1 = vmul.f32 %v1064_v34, %v1064_v34  ;;  %v3189_v4 = vmul.f32 1.4142135, %v1006_v61  ;;  %v1008_v7 = vld [vmem:[%s4857_s1 + $0x68] sm:$0xff] }
   0xe   :  { %v1186_v2 = vsel %vm24_vm0, %v1112_v58, 0.0  ;;  %v1113_v6 = vmul.f32 %v3170_v59, %v3170_v59  ;;  %v3196_v8 = vmul.f32 1.4142135, %v1018_v62  ;;  %v3200_v9 = vmul.f32 1.4142135, %v1007_v63  ;;  %v1019_v10 = vld [vmem:[%s4857_s1 + $0xc0] sm:$0xff] }
   0xf   :  { %1178 = vadd.xlane.f32.xlu1 %v1177_v36  ;;  %1127 = vadd.xlane.f32.xlu0 %v1126_v37  ;;  %v1009_v11 = vld [vmem:[%s4857_s1 + $0x70] sm:$0xff]  ;;  %v3211_v12 = vld [vmem:[%s4860_s4] sm:$0xff]  ;;  %v1138_v13 = vsel %vm24_vm0, %v1096_v1, 0.0  ;;  %v3214_v14 = vmul.f32 1.4142135, %v1008_v7  ;;  %v1097_v15 = vmul.f32 %v1065_v41, %v1065_v41  ;;  %v3221_v18 = vld [vmem:[%s4860_s4 + $0x8] sm:$0xff]  ;;  %v1098_v30 = vmul.f32 %v1066_v45, %v1066_v45 }
  0x10   :  { %2695 = vmatmul.mubr.msk.f32.gmra.mrb[4].mxu0 %vm24_vm0, %v1064_v34  ;;  %v2368_v16 = vsel %vm2367_vm1, %v3211_v12, 0.0  ;;  %v1189_v19 = vsel %vm24_vm0, %v1113_v6, 0.0  ;;  %v1114_v21 = vmul.f32 %v3196_v8, %v3196_v8  ;;  %v1010_v22 = vld [vmem:[%s4857_s1 + $0x78] sm:$0xff]  ;;  %v3231_v23 = vmul.f32 1.4142135, %v1019_v10  ;;  %v1020_v26 = vld [vmem:[%s4857_s1 + $0xc8] sm:$0xff] }
  0x11   :  { %2697 = vmatprep.mubr.msk.f32.mxu0 %vm24_vm0, %v1065_v41  ;;  %v2369_v24 = vsel %vm2367_vm1, %v3221_v18, 0.0  ;;  %v3237_v25 = vmul.f32 1.4142135, %v1009_v11  ;;  %v3244_v28 = vmul.f32 1.4142135, %v1010_v22  ;;  %v1141_v31 = vsel %vm24_vm0, %v1097_v15, 0.0 }
  0x12   :  { %v3242_v27 = vadd.f32 %v2369_v24, %v2368_v16  ;;  %v1192_v32 = vsel %vm24_vm0, %v1114_v21, 0.0  ;;  %v1115_v33 = vmul.f32 %v3231_v23, %v3231_v23  ;;  %v1084_v34 = vmul.f32 1.4142135, %v1020_v26 }
  0x13   :  { %1130 = vadd.xlane.f32.xlu1 %v1129_v44  ;;  %1181 = vadd.xlane.f32.xlu0 %v1180_v46 }
  0x14   :  { %2698 = vmatmul.mubr.msk.f32.gmra.mrb[6].mxu0 %vm24_vm0, %v1066_v45 }
  0x15   :  { %2700 = vmatprep.mubr.msk.f32.mxu0 %vm24_vm0, %v3155_v51 }
  0x17   :  { %1184 = vadd.xlane.f32.xlu1 %v1183_v56  ;;  %1133 = vadd.xlane.f32.xlu0 %v1132_v57 }
  0x18   :  { %2701 = vmatmul.mubr.msk.f32.gmra.mrb[8].mxu0 %vm24_vm0, %v3163_v54 }
  0x19   :  { %2703 = vmatprep.mubr.msk.f32.mxu0 %vm24_vm0, %v3174_v60 }
  0x1b   :  { %1136 = vadd.xlane.f32.xlu1 %v1135_v0  ;;  %1187 = vadd.xlane.f32.xlu0 %v1186_v2 }
  0x1c   :  { %2704 = vmatmul.mubr.msk.f32.gmra.mrb[10].mxu0 %vm24_vm0, %v3189_v4 }
  0x1d   :  { %2706 = vmatprep.mubr.msk.f32.mxu0 %vm24_vm0, %v3200_v9 }
  0x1f   :  { %1190 = vadd.xlane.f32.xlu1 %v1189_v19  ;;  %1139 = vadd.xlane.f32.xlu0 %v1138_v13 }
  0x20   :  { %2707 = vmatmul.mubr.msk.f32.gmra.mrb[12].mxu0 %vm24_vm0, %v3214_v14 }
  0x21   :  { %10 = vsyncpa [#allocation3], 0  ;;  %2709 = vmatprep.mubr.msk.f32.mxu0 %vm24_vm0, %v3237_v25  ;;  %v1021_v35 = vld [vmem:[%s4857_s1 + $0xd0] sm:$0xff]  ;;  %v1144_v36 = vsel %vm24_vm0, %v1098_v30, 0.0  ;;  %v1195_v37 = vsel %vm24_vm0, %v1115_v33, 0.0  ;;  %v1099_v38 = vmul.f32 %v3155_v51, %v3155_v51  ;;  %v1116_v39 = vmul.f32 %v1084_v34, %v1084_v34  ;;  %v1022_v42 = vld [vmem:[%s4857_s1 + $0xd8] sm:$0xff] }
  0x22   :  { %v1085_v41 = vmul.f32 1.4142135, %v1021_v35  ;;  %v1100_v43 = vmul.f32 %v3163_v54, %v3163_v54  ;;  %v1086_v47 = vmul.f32 1.4142135, %v1022_v42  ;;  %v1101_v48 = vmul.f32 %v3174_v60, %v3174_v60  ;;  %v3342_v15 = vld [vmem:[%s4860_s4 + $0x88] sm:$0xff]  ;;  %v3348_v16 = vld [vmem:[%s4860_s4 + $0x10] sm:$0xff] }
  0x23   :  { %1142 = vadd.xlane.f32.xlu1 %v1141_v31  ;;  %1193 = vadd.xlane.f32.xlu0 %v1192_v32  ;;  %v1147_v44 = vsel %vm24_vm0, %v1099_v38, 0.0  ;;  %v1198_v45 = vsel %vm24_vm0, %v1116_v39, 0.0  ;;  %v1102_v55 = vmul.f32 %v3189_v4, %v3189_v4  ;;  %v1103_v57 = vmul.f32 %v3200_v9, %v3200_v9  ;;  %v1045_v19 = vld [vmem:[%s4860_s4 + $0x90] sm:$0xff]  ;;  %v3367_v21 = vld [vmem:[%s4860_s4 + $0x20] sm:$0xff]  ;;  %v1048_v24 = vld [vmem:[%s4860_s4 + $0xa8] sm:$0xff]  ;;  %s3023_s11 = smov 1.0  }
  0x24   :  { %2710 = vmatmul.mubr.msk.f32.gmra.mrb[14].mxu0 %vm24_vm0, %v3244_v28  ;;  %v1117_v46 = vmul.f32 %v1085_v41, %v1085_v41  ;;  %v1150_v49 = vsel %vm24_vm0, %v1100_v43, 0.0  ;;  %v1118_v51 = vmul.f32 %v1086_v47, %v1086_v47  ;;  %v1153_v53 = vsel %vm24_vm0, %v1101_v48, 0.0  ;;  %v1047_v22 = vld [vmem:[%s4860_s4 + $0xa0] sm:$0xff]  ;;  %v3388_v26 = vld [vmem:[%s4860_s4 + $0x30] sm:$0xff]  ;;  %v3400_v31 = vld [vmem:[%s4860_s4 + $0x38] sm:$0xff]  ;;  %s3009_s16 = scalar_lea.hbm %s4861_s5, 16 }
  0x25   :  { %2712 = vmatprep.mubr.msk.f32.mxu0 %vm24_vm0, %v3093_v17  ;;  %v1023_v17 = vld [vmem:[%s4857_s1 + $0xe0] sm:$0xff]  ;;  %v1156_v58 = vsel %vm24_vm0, %v1102_v55, 0.0  ;;  %v1159_v62 = vsel %vm24_vm0, %v1103_v57, 0.0  ;;  %v1104_v1 = vmul.f32 %v3214_v14, %v3214_v14  ;;  %v1105_v7 = vmul.f32 %v3237_v25, %v3237_v25  ;;  %v1049_v25 = vld [vmem:[%s4860_s4 + $0xb0] sm:$0xff]  ;;  %v1052_v35 = vld [vmem:[%s4860_s4 + $0xc8] sm:$0xff]  ;;  %p3010_p0 = scmp.ne.s32.totalorder %s4861_s5, %s3009_s16  ;;  %p3013_p1 = scmp.lt.u32.totalorder %s3009_s16, %s4861_s5 }
  0x26   :  { %v1087_v52 = vmul.f32 1.4142135, %v1023_v17  ;;  %v1106_v11 = vmul.f32 %v3244_v28, %v3244_v28  ;;  %v3335_v14 = vld [vmem:[%s4860_s4 + $0x80] sm:$0xff]  ;;  %v1050_v28 = vld [vmem:[%s4860_s4 + $0xb8] sm:$0xff]  ;;  %v1053_v30 = vld [vmem:[%s4860_s4 + $0xd0] sm:$0xff]  ;;  %vm2335_vm4 = vcmask 60416  }
  0x27   :  { %1196 = vadd.xlane.f32.xlu1 %v1195_v37  ;;  %1145 = vadd.xlane.f32.xlu0 %v1144_v36  ;;  %v1162_v6 = vsel %vm24_vm0, %v1104_v1, 0.0  ;;  %v1165_v9 = vsel %vm24_vm0, %v1105_v7, 0.0  ;;  %v3405_v32 = vld [vmem:[%s4860_s4 + $0x50] sm:$0xff]  ;;  %v1051_v33 = vld [vmem:[%s4860_s4 + $0xc0] sm:$0xff]  ;;  %v3436_v39 = vld [vmem:[%s4860_s4 + $0x48] sm:$0xff]  ;;  %vm2344_vm5 = vcmask 57344   ;;  %p3015_p2 = pnand %p3013_p1, %p3010_p0 }
  0x28   :  { %2713 = vmatmul.mubr.msk.f32.gmra.mrb[16].mxu0 %vm24_vm0, %v3066_v5  ;;  %v1201_v5 = vsel %vm24_vm0, %v1117_v46, 0.0  ;;  %v1119_v54 = vmul.f32 %v1087_v52, %v1087_v52  ;;  %v1168_v13 = vsel %vm24_vm0, %v1106_v11, 0.0  ;;  %v3421_v36 = vld [vmem:[%s4860_s4 + $0x60] sm:$0xff]  ;;  %v1057_v38 = vld [vmem:[%s4860_s4 + $0xf0] sm:$0xff]  ;;  %v3445_v42 = vld [vmem:[%s4860_s4 + $0x58] sm:$0xff] }
  0x29   :  { %2715 = vmatprep.mubr.msk.f32.mxu0 %vm24_vm0, %v3098_v20  ;;  %v1024_v20 = vld [vmem:[%s4857_s1 + $0xe8] sm:$0xff]  ;;  %v3426_v37 = vld [vmem:[%s4860_s4 + $0x40] sm:$0xff] }
  0x2a   :  { %v1088_v56 = vmul.f32 1.4142135, %v1024_v20  ;;  %v1056_v43 = vld [vmem:[%s4860_s4 + $0xe8] sm:$0xff] }
  0x2b   :  { %1148 = vadd.xlane.f32.xlu1 %v1147_v44  ;;  %1199 = vadd.xlane.f32.xlu0 %v1198_v45  ;;  %v3454_v45 = vld [vmem:[%s4860_s4 + $0x68] sm:$0xff] }
  0x2c   :  { %2716 = vmatmul.mubr.msk.f32.gmra.mrb[18].mxu0 %vm24_vm0, %v3117_v29  ;;  %v1204_v29 = vsel %vm24_vm0, %v1118_v51, 0.0  ;;  %v1120_v60 = vmul.f32 %v1088_v56, %v1088_v56 }
  0x2d   :  { %2718 = vmatprep.mubr.msk.f32.mxu0 %vm24_vm0, %v3135_v40  ;;  %v1025_v40 = vld [vmem:[%s4857_s1 + $0xf0] sm:$0xff] }
  0x2e   :  { %v1089_v61 = vmul.f32 1.4142135, %v1025_v40  ;;  %v1210_v63 = vsel %vm24_vm0, %v1120_v60, 0.0 }
  0x2f   :  { %1202 = vadd.xlane.f32.xlu1 %v1201_v5  ;;  %1151 = vadd.xlane.f32.xlu0 %v1150_v49 }
  0x30   :  { %2719 = vmatmul.mubr.msk.f32.gmra.mrb[20].mxu0 %vm24_vm0, %v3152_v50  ;;  %v1207_v50 = vsel %vm24_vm0, %v1119_v54, 0.0  ;;  %v1121_v0 = vmul.f32 %v1089_v61, %v1089_v61 }
  0x31   :  { %2721 = vmatprep.mubr.msk.f32.mxu0 %vm24_vm0, %v3170_v59  ;;  %v1026_v59 = vld [vmem:[%s4857_s1 + $0xf8] sm:$0xff] }
  0x32   :  { %v1090_v2 = vmul.f32 1.4142135, %v1026_v59  ;;  %v1213_v4 = vsel %vm24_vm0, %v1121_v0, 0.0 }
  0x33   :  { %1154 = vadd.xlane.f32.xlu1 %v1153_v53  ;;  %1205 = vadd.xlane.f32.xlu0 %v1204_v29 }
  0x34   :  { %2722 = vmatmul.mubr.msk.f32.gmra.mrb[22].mxu0 %vm24_vm0, %v3196_v8  ;;  %v1122_v8 = vmul.f32 %v1090_v2, %v1090_v2 }
  0x35   :  { %2724 = vmatprep.mubr.msk.f32.mxu0 %vm24_vm0, %v3231_v23  ;;  %v3376_v23 = vld [vmem:[%s4860_s4 + $0x28] sm:$0xff] }
  0x36   :  { %v1216_v10 = vsel %vm24_vm0, %v1122_v8, 0.0 }
  0x37   :  { %1208 = vadd.xlane.f32.xlu1 %v1207_v50  ;;  %1157 = vadd.xlane.f32.xlu0 %v1156_v58  ;;  %v309_v58 = vlaneseq }
  0x38   :  { %2725 = vmatmul.mubr.msk.f32.gmra.mrb[24].mxu0 %vm24_vm0, %v1084_v34  ;;  %v1055_v34 = vld [vmem:[%s4860_s4 + $0xe0] sm:$0xff] }
  0x39   :  { %2727 = vmatprep.mubr.msk.f32.mxu0 %vm24_vm0, %v1085_v41  ;;  %v1054_v41 = vld [vmem:[%s4860_s4 + $0xd8] sm:$0xff]  ;;  %v3477_v59 = vshrl.u32 %v309_v58, 7 }
  0x3b   :  { %1160 = vadd.xlane.f32.xlu1 %v1159_v62  ;;  %1211 = vadd.xlane.f32.xlu0 %v1210_v63  ;;  %4905 = vst [vmem:[#allocation5_spill] sm:$0xff] %v3477_v59 }
  0x3c   :  { %2728 = vmatmul.mubr.msk.f32.gmra.mrb[26].mxu0 %vm24_vm0, %v1086_v47 }
  0x3d   :  { %2730 = vmatprep.mubr.msk.f32.mxu0 %vm24_vm0, %v1087_v52 }
  0x3f   :  { %1214 = vadd.xlane.f32.xlu1 %v1213_v4  ;;  %1163 = vadd.xlane.f32.xlu0 %v1162_v6 }
  0x40   :  { %2731 = vmatmul.mubr.msk.f32.gmra.mrb[28].mxu0 %vm24_vm0, %v1088_v56 }
  0x41   :  { %2733 = vmatprep.mubr.msk.f32.mxu0 %vm24_vm0, %v1089_v61  ;;  %v310_v61 = vand.u32 127, %v309_v58 }
  0x43   :  { %1166 = vadd.xlane.f32.xlu1 %v1165_v9  ;;  %1217 = vadd.xlane.f32.xlu0 %v1216_v10  ;;  %v3484_v0 = vsub.s32 %v310_v61, %v3477_v59 }
  0x44   :  { %2734 = vmatmul.mubr.msk.f32.gmra.mrb[30].mxu0 %vm24_vm0, %v1090_v2 }
  0x45   :  { %4906 = vst [vmem:[#allocation6_spill] sm:$0xff] %v3484_v0 }
  0x47   :  { %1169 = vadd.xlane.f32.xlu0 %v1168_v13 }
  0x54   :  { %2134 = vperm.xlu1 %2782, %v3335_v14  }
  0x58   :  { %2054 = vperm.xlu1 %2782, %v3211_v12   ;;  %v3358_v12 = vld [vmem:[%s4860_s4 + $0x18] sm:$0xff] }
  0x5c   :  { %2059 = vperm.xlu1 %2782, %v3221_v18   ;;  %v1046_v18 = vld [vmem:[%s4860_s4 + $0x98] sm:$0xff] }
  0x5d   :  { %2139 = vperm.xlu0 %2783, %v3342_v15  }
  0x60   :  { %2064 = vperm.xlu1 %2782, %v3348_v16  }
  0x61   :  { %2144 = vperm.xlu0 %2783, %v1045_v19  }
  0x64   :  { %2069 = vperm.xlu1 %2782, %v3358_v12  }
  0x65   :  { %2149 = vperm.xlu0 %2783, %v1046_v18  }
  0x68   :  { %2074 = vperm.xlu1 %2782, %v3367_v21  }
  0x69   :  { %2154 = vperm.xlu0 %2783, %v1047_v22  }
  0x6c   :  { %2079 = vperm.xlu1 %2782, %v3376_v23  }
  0x6d   :  { %2159 = vperm.xlu0 %2783, %v1048_v24  }
  0x70   :  { %2164 = vperm.xlu1 %2782, %v1049_v25  }
  0x71   :  { %2084 = vperm.xlu0 %2783, %v3388_v26  }
  0x74   :  { %2169 = vperm.xlu1 %2782, %v1050_v28  }
  0x75   :  { %2184 = vperm.xlu0 %2783, %v1053_v30  }
  0x78   :  { %2089 = vperm.xlu1 %2782, %v3400_v31  }
  0x79   :  { %2104 = vperm.xlu0 %2783, %v3405_v32  }
  0x7c   :  { %2174 = vperm.xlu1 %2782, %v1051_v33  }
  0x7d   :  { %2194 = vperm.xlu0 %2783, %v1055_v34  }
  0x80   :  { %2179 = vperm.xlu1 %2782, %v1052_v35  }
  0x81   :  { %2114 = vperm.xlu0 %2783, %v3421_v36  }
  0x84   :  { %2094 = vperm.xlu1 %2782, %v3426_v37  }
  0x85   :  { %2204 = vperm.xlu0 %2783, %v1057_v38  }
  0x88   :  { %2099 = vperm.xlu1 %2782, %v3436_v39  }
  0x8c   :  { %2189 = vperm.xlu1 %2782, %v1054_v41  }
  0x90   :  { %2109 = vperm.xlu1 %2782, %v3445_v42  }
  0x94   :  { %2199 = vperm.xlu1 %2782, %v1056_v43   ;;  %v31_v44 = vpop.xlane.xlu0 %30  ;;  %v3459_v47 = vpop.xlane.xlu1 %1175 }
  0x95   :  { %v3489_v2 = vrot.slane %v31_v44, %v3484_v0 }
  0x97   :  { %4907 = vst [vmem:[#allocation7_spill] sm:$0xff] %v3489_v2 }
  0x98   :  { %2119 = vperm.xlu1 %2782, %v3454_v45   ;;  %v3457_v46 = vpop.xlane.xlu0 %1172  ;;  %v1125_v48 = vpop.xlane.xlu1 %1124 }
  0x99   :  { %v1540_v10 = vadd.f32 %v1125_v48, %v3489_v2 }
  0x9c   :  { %v1128_v17 = vpop.xlane.xlu0 %1127  ;;  %v3463_v49 = vpop.xlane.xlu1 %1178 }
  0x9d   :  { %v1541_v7 = vadd.f32 %v1128_v17, %v3489_v2 }
  0xa0   :  { %v3461_v5 = vpop.xlane.xlu0 %1181  ;;  %v1131_v52 = vpop.xlane.xlu1 %1130 }
  0xa1   :  { %v1542_v34 = vadd.f32 %v1131_v52, %v3489_v2 }
  0xa4   :  { %v1134_v51 = vpop.xlane.xlu0 %1133  ;;  %v3467_v53 = vpop.xlane.xlu1 %1184 }
  0xa5   :  { %v1543_v25 = vadd.f32 %v1134_v51, %v3489_v2 }
  0xa8   :  { %v3465_v20 = vpop.xlane.xlu0 %1187  ;;  %v1137_v54 = vpop.xlane.xlu1 %1136 }
  0xac   :  { %v1140_v29 = vpop.xlane.xlu0 %1139  ;;  %v3471_v56 = vpop.xlane.xlu1 %1190 }
  0xad   :  { %v1545_v51 = vadd.f32 %v1140_v29, %v3489_v2 }
  0xb0   :  { %v3469_v55 = vpop.xlane.xlu0 %1193  ;;  %v1143_v57 = vpop.xlane.xlu1 %1142 }
  0xb4   :  { %v1146_v40 = vpop.xlane.xlu0 %1145  ;;  %v3475_v60 = vpop.xlane.xlu1 %1196 }
  0xb8   :  { %v3473_v50 = vpop.xlane.xlu0 %1199  ;;  %v3481_v63 = vpop.xlane.xlu1 %1148 }
  0xbc   :  { %v3479_v62 = vpop.xlane.xlu0 %1151  ;;  %v3491_v4 = vpop.xlane.xlu1 %1202 }
  0xc0   :  { %v3486_v1 = vpop.xlane.xlu0 %1205  ;;  %v3497_v19 = vpop.xlane.xlu1 %1154 }
  0xc4   :  { %v3495_v11 = vpop.xlane.xlu0 %1157  ;;  %v3510_v61 = vpop.xlane.xlu1 %1208 }
  0xc8   :  { %v3506_v44 = vpop.xlane.xlu0 %1211 }
  0xdb   :  { %v2690_v6 = vpop.f32.mrb[0].mxu0 }
  0xdc   :  { %v1573_v8 = vmul.f32 2.0, %v2690_v6  ;;  %v1381_v9 = vpop.f32.mrb[1].mxu0 }
  0xdd   :  { %v1572_v13 = vmul.f32 2.0, %v1381_v9  ;;  %v1544_v9 = vadd.f32 %v1137_v54, %v3489_v2 }
  0xde   :  { %v1605_v18 = vsub.f32 %v1541_v7, %v1573_v8 }
  0xdf   :  { %v1604_v22 = vsub.f32 %v1540_v10, %v1572_v13  ;;  %v2693_v24 = vpop.f32.mrb[2].mxu0 }
  0xe0   :  { %v1575_v28 = vmul.f32 2.0, %v2693_v24  ;;  %v1391_v30 = vpop.f32.mrb[3].mxu0  ;;  %v3500_v33 = vmax.f32 %v1605_v18, 0.0 }
  0xe1   :  { %v1574_v35 = vmul.f32 2.0, %v1391_v30  ;;  %v3503_v38 = vmax.f32 %v1604_v22, 0.0  ;;  %v1547_v30 = vadd.f32 %v1146_v40, %v3489_v2  ;;  %v1161_v40 = vpop.xlane.xlu1 %1160 }
  0xe2   :  { %v1607_v41 = vsub.f32 %v1543_v25, %v1575_v28  ;;  %v4868_v43 = vsub.f32 0.0, %v3500_v33 }
  0xe3   :  { %v1606_v17 = vsub.f32 %v1542_v34, %v1574_v35  ;;  %v2696_v48 = vpop.f32.mrb[4].mxu0  ;;  %v4866_v58 = vsub.f32 0.0, %v3503_v38 }
  0xe4   :  { %v1577_v6 = vmul.f32 2.0, %v2696_v48  ;;  %v1401_v7 = vpop.f32.mrb[5].mxu0  ;;  %v1703_v52 = vsel %vm24_vm0, %v4868_v43, -inf  ;;  %v3515_v8 = vmax.f32 %v1607_v41, 0.0  ;;  %v1164_v48 = vpop.xlane.xlu0 %1163 }
  0xe5   :  { %v1576_v10 = vmul.f32 2.0, %v1401_v7  ;;  %1704 = vmax.xlane.f32.xlu0 %v1703_v52  ;;  %v1700_v13 = vsel %vm24_vm0, %v4866_v58, -inf  ;;  %v3521_v18 = vmax.f32 %v1606_v17, 0.0  ;;  %v1546_v17 = vadd.f32 %v1143_v57, %v3489_v2 }
  0xe6   :  { %v1609_v29 = vsub.f32 %v1545_v51, %v1577_v6  ;;  %1701 = vmax.xlane.f32.xlu1 %v1700_v13  ;;  %v4864_v22 = vsub.f32 0.0, %v3515_v8  ;;  %v1549_v57 = vadd.f32 %v3479_v62, %v3489_v2 }
  0xe7   :  { %v1608_v24 = vsub.f32 %v1544_v9, %v1576_v10  ;;  %v2699_v25 = vpop.f32.mrb[6].mxu0  ;;  %v4863_v28 = vsub.f32 0.0, %v3521_v18 }
  0xe8   :  { %v1579_v34 = vmul.f32 2.0, %v2699_v25  ;;  %v1411_v54 = vpop.f32.mrb[7].mxu0  ;;  %v1709_v35 = vsel %vm24_vm0, %v4864_v22, -inf  ;;  %v3529_v41 = vmax.f32 %v1609_v29, 0.0 }
  0xe9   :  { %v1578_v51 = vmul.f32 2.0, %v1411_v54  ;;  %1710 = vmax.xlane.f32.xlu0 %v1709_v35  ;;  %v1706_v6 = vsel %vm24_vm0, %v4863_v28, -inf  ;;  %v3535_v7 = vmax.f32 %v1608_v24, 0.0 }
  0xea   :  { %v1611_v52 = vsub.f32 %v1547_v30, %v1579_v34  ;;  %1707 = vmax.xlane.f32.xlu1 %v1706_v6  ;;  %v4862_v9 = vsub.f32 0.0, %v3529_v41  ;;  %v1548_v30 = vadd.f32 %v3481_v63, %v3489_v2  ;;  %v1551_v63 = vadd.f32 %v3495_v11, %v3489_v2 }
  0xeb   :  { %v1610_v10 = vsub.f32 %v1546_v17, %v1578_v51  ;;  %v2702_v13 = vpop.f32.mrb[8].mxu0  ;;  %v4865_v29 = vsub.f32 0.0, %v3535_v7 }
  0xec   :  { %v1581_v25 = vmul.f32 2.0, %v2702_v13  ;;  %v1421_v54 = vpop.f32.mrb[9].mxu0  ;;  %v1715_v35 = vsel %vm24_vm0, %v4862_v9, -inf  ;;  %v3544_v24 = vmax.f32 %v1611_v52, 0.0  ;;  %v3554_v13 = vpop.xlane.xlu0 %1217 }
  0xed   :  { %v1580_v34 = vmul.f32 2.0, %v1421_v54  ;;  %1716 = vmax.xlane.f32.xlu0 %v1715_v35  ;;  %v1712_v17 = vsel %vm24_vm0, %v4865_v29, -inf  ;;  %v3551_v51 = vmax.f32 %v1610_v10, 0.0  ;;  %v3559_v54 = vpop.xlane.xlu1 %1214 }
  0xee   :  { %v1613_v62 = vsub.f32 %v1549_v57, %v1581_v25  ;;  %1713 = vmax.xlane.f32.xlu1 %v1712_v17  ;;  %v4867_v6 = vsub.f32 0.0, %v3544_v24  ;;  %v1550_v25 = vadd.f32 %v3497_v19, %v3489_v2 }
  0xef   :  { %v1612_v9 = vsub.f32 %v1548_v30, %v1580_v34  ;;  %v2705_v52 = vpop.f32.mrb[10].mxu0  ;;  %v4869_v28 = vsub.f32 0.0, %v3551_v51 }
  0xf0   :  { %v1583_v35 = vmul.f32 2.0, %v2705_v52  ;;  %v1431_v22 = vpop.f32.mrb[11].mxu0  ;;  %v1721_v10 = vsel %vm24_vm0, %v4867_v6, -inf  ;;  %v3564_v57 = vmax.f32 %v1613_v62, 0.0  ;;  %v1553_v6 = vadd.f32 %v1164_v48, %v3489_v2 }
  0xf1   :  { %v1582_v30 = vmul.f32 2.0, %v1431_v22  ;;  %1722 = vmax.xlane.f32.xlu0 %v1721_v10  ;;  %v1718_v34 = vsel %vm24_vm0, %v4869_v28, -inf  ;;  %v3571_v11 = vmax.f32 %v1612_v9, 0.0  ;;  %v1552_v9 = vadd.f32 %v1161_v40, %v3489_v2  ;;  %v1167_v48 = vpop.xlane.xlu1 %1166 }
  0xf2   :  { %v1615_v17 = vsub.f32 %v1551_v63, %v1583_v35  ;;  %1719 = vmax.xlane.f32.xlu1 %v1718_v34  ;;  %v4870_v52 = vsub.f32 0.0, %v3564_v57  ;;  %v1170_v63 = vpop.xlane.xlu0 %1169 }
  0xf3   :  { %v1614_v29 = vsub.f32 %v1550_v25, %v1582_v30  ;;  %v2708_v58 = vpop.f32.mrb[12].mxu0  ;;  %v4872_v62 = vsub.f32 0.0, %v3571_v11  ;;  %v1555_v40 = vadd.f32 %v1170_v63, %v3489_v2 }
  0xf4   :  { %v1585_v43 = vmul.f32 2.0, %v2708_v58  ;;  %v1441_v19 = vpop.f32.mrb[13].mxu0  ;;  %v1727_v22 = vsel %vm24_vm0, %v4870_v52, -inf  ;;  %v3579_v10 = vmax.f32 %v1615_v17, 0.0 }
  0xf5   :  { %v1584_v35 = vmul.f32 2.0, %v1441_v19  ;;  %1728 = vmax.xlane.f32.xlu0 %v1727_v22  ;;  %v1724_v25 = vsel %vm24_vm0, %v4872_v62, -inf  ;;  %v3585_v30 = vmax.f32 %v1614_v29, 0.0  ;;  %v1554_v29 = vadd.f32 %v1167_v48, %v3489_v2 }
  0xf6   :  { %v1617_v58 = vsub.f32 %v1553_v6, %v1585_v43  ;;  %1725 = vmax.xlane.f32.xlu1 %v1724_v25  ;;  %v4873_v34 = vsub.f32 0.0, %v3579_v10 }
  0xf7   :  { %v1616_v28 = vsub.f32 %v1552_v9, %v1584_v35  ;;  %v2711_v52 = vpop.f32.mrb[14].mxu0  ;;  %v4874_v17 = vsub.f32 0.0, %v3585_v30 }
  0xf8   :  { %v1587_v0 = vmul.f32 2.0, %v2711_v52  ;;  %v1451_v19 = vpop.f32.mrb[15].mxu0  ;;  %v1733_v22 = vsel %vm24_vm0, %v4873_v34, -inf  ;;  %v3593_v62 = vmax.f32 %v1617_v58, 0.0  ;;  %v1557_v58 = vadd.f32 %v3459_v47, %v3489_v2 }
  0xf9   :  { %v1586_v43 = vmul.f32 2.0, %v1451_v19  ;;  %1734 = vmax.xlane.f32.xlu0 %v1733_v22  ;;  %v1730_v6 = vsel %vm24_vm0, %v4874_v17, -inf  ;;  %v3599_v9 = vmax.f32 %v1616_v28, 0.0 }
  0xfa   :  { %v1619_v35 = vsub.f32 %v1555_v40, %v1587_v0  ;;  %1731 = vmax.xlane.f32.xlu1 %v1730_v6  ;;  %v4875_v52 = vsub.f32 0.0, %v3593_v62  ;;  %v1556_v0 = vadd.f32 %v3457_v46, %v3489_v2 }
  0xfb   :  { %v1618_v63 = vsub.f32 %v1554_v29, %v1586_v43  ;;  %v2714_v25 = vpop.f32.mrb[16].mxu0  ;;  %v4876_v34 = vsub.f32 0.0, %v3599_v9 }
  0xfc   :  { %v1589_v48 = vmul.f32 2.0, %v2714_v25  ;;  %v1461_v19 = vpop.f32.mrb[17].mxu0  ;;  %v1739_v22 = vsel %vm24_vm0, %v4875_v52, -inf  ;;  %v3608_v17 = vmax.f32 %v1619_v35, 0.0  ;;  %v1559_v52 = vadd.f32 %v3461_v5, %v3489_v2 }
  0xfd   :  { %v1588_v28 = vmul.f32 2.0, %v1461_v19  ;;  %1740 = vmax.xlane.f32.xlu0 %v1739_v22  ;;  %v1736_v40 = vsel %vm24_vm0, %v4876_v34, -inf  ;;  %v3615_v29 = vmax.f32 %v1618_v63, 0.0  ;;  %v1558_v63 = vadd.f32 %v3463_v49, %v3489_v2 }
  0xfe   :  { %v1621_v47 = vsub.f32 %v1557_v58, %v1589_v48  ;;  %1737 = vmax.xlane.f32.xlu1 %v1736_v40  ;;  %v4877_v43 = vsub.f32 0.0, %v3608_v17 }
  0xff   :  { %v1620_v6 = vsub.f32 %v1556_v0, %v1588_v28  ;;  %v2717_v25 = vpop.f32.mrb[18].mxu0  ;;  %v4878_v35 = vsub.f32 0.0, %v3615_v29 }
 0x100   :  { %v1591_v46 = vmul.f32 2.0, %v2717_v25  ;;  %v1471_v19 = vpop.f32.mrb[19].mxu0  ;;  %v1745_v22 = vsel %vm24_vm0, %v4877_v43, -inf  ;;  %v3624_v34 = vmax.f32 %v1621_v47, 0.0  ;;  %v1561_v43 = vadd.f32 %v3465_v20, %v3489_v2 }
 0x101   :  { %v1590_v58 = vmul.f32 2.0, %v1471_v19  ;;  %1746 = vmax.xlane.f32.xlu0 %v1745_v22  ;;  %v1742_v48 = vsel %vm24_vm0, %v4878_v35, -inf  ;;  %v3631_v0 = vmax.f32 %v1620_v6, 0.0 }
 0x102   :  { %v1623_v5 = vsub.f32 %v1559_v52, %v1591_v46  ;;  %1743 = vmax.xlane.f32.xlu1 %v1742_v48  ;;  %v4879_v28 = vsub.f32 0.0, %v3624_v34  ;;  %v1560_v52 = vadd.f32 %v3467_v53, %v3489_v2 }
 0x103   :  { %v1622_v40 = vsub.f32 %v1558_v63, %v1590_v58  ;;  %v2720_v25 = vpop.f32.mrb[20].mxu0  ;;  %v4880_v47 = vsub.f32 0.0, %v3631_v0 }
 0x104   :  { %v1593_v49 = vmul.f32 2.0, %v2720_v25  ;;  %v1481_v19 = vpop.f32.mrb[21].mxu0  ;;  %v1751_v22 = vsel %vm24_vm0, %v4879_v28, -inf  ;;  %v3640_v35 = vmax.f32 %v1623_v5, 0.0  ;;  %v1563_v28 = vadd.f32 %v3469_v55, %v3489_v2 }
 0x105   :  { %v1592_v6 = vmul.f32 2.0, %v1481_v19  ;;  %1752 = vmax.xlane.f32.xlu0 %v1751_v22  ;;  %v1748_v46 = vsel %vm24_vm0, %v4880_v47, -inf  ;;  %v3647_v63 = vmax.f32 %v1622_v40, 0.0  ;;  %v1562_v40 = vadd.f32 %v3471_v56, %v3489_v2 }
 0x106   :  { %v1625_v20 = vsub.f32 %v1561_v43, %v1593_v49  ;;  %1749 = vmax.xlane.f32.xlu1 %v1748_v46  ;;  %v4882_v58 = vsub.f32 0.0, %v3640_v35  ;;  %v3661_v43 = vld [vmem:[%s4856_s0] sm:$0xff]  ;;  %v3665_v49 = vpop.permute.xlu1 %2134  ;;  %v3677_v46 = vld [vmem:[%s4856_s0 + $0x8] sm:$0xff] }
 0x107   :  { %v1624_v48 = vsub.f32 %v1560_v52, %v1592_v6  ;;  %v2723_v25 = vpop.f32.mrb[22].mxu0  ;;  %v4881_v5 = vsub.f32 0.0, %v3647_v63  ;;  %4908 = vst [vmem:[#allocation8_spill] sm:$0xff] %v3665_v49  ;;  %2636 = vmatprep.mubr.msk.f32.mxu1 %vm24_vm0, %v3661_v43 }
 0x108   :  { %v1595_v53 = vmul.f32 2.0, %v2723_v25  ;;  %v1491_v19 = vpop.f32.mrb[23].mxu0  ;;  %v1757_v22 = vsel %vm24_vm0, %v4882_v58, -inf  ;;  %v3656_v47 = vmax.f32 %v1625_v20, 0.0  ;;  %2637 = vmatmul.mubr.msk.f32.vlgmr.msra.gmra.mrb[0].mxu1 %vm24_vm0, %v3677_v46 }
 0x109   :  { %v1594_v52 = vmul.f32 2.0, %v1491_v19  ;;  %1758 = vmax.xlane.f32.xlu0 %v1757_v22  ;;  %v1754_v55 = vsel %vm24_vm0, %v4881_v5, -inf  ;;  %v3670_v6 = vmax.f32 %v1624_v48, 0.0  ;;  %2661 = vmatpush3.xpose.msk.msra.mxu1 %vm24_vm0, %v3064_v3  ;;  %v1565_v22 = vadd.f32 %v3473_v50, %v3489_v2  ;;  %v3702_v50 = vld [vmem:[%s4856_s0 + $0x10] sm:$0xff] }
 0x10a   :  { %v1627_v20 = vsub.f32 %v1563_v28, %v1595_v53  ;;  %1755 = vmax.xlane.f32.xlu1 %v1754_v55  ;;  %v4884_v56 = vsub.f32 0.0, %v3656_v47  ;;  %2639 = vmatprep.mubr.msk.f32.mxu1 %vm24_vm0, %v3702_v50 }
 0x10b   :  { %v1626_v25 = vsub.f32 %v1562_v40, %v1594_v52  ;;  %v2726_v19 = vpop.f32.mrb[24].mxu0  ;;  %v4883_v48 = vsub.f32 0.0, %v3670_v6  ;;  %v1564_v40 = vadd.f32 %v3475_v60, %v3489_v2  ;;  %v3710_v60 = vld [vmem:[%s4856_s0 + $0x18] sm:$0xff] }
 0x10c   :  { %v1597_v5 = vmul.f32 2.0, %v2726_v19  ;;  %v1501_v58 = vpop.f32.mrb[25].mxu0  ;;  %v1763_v28 = vsel %vm24_vm0, %v4884_v56, -inf  ;;  %v3690_v53 = vmax.f32 %v1627_v20, 0.0  ;;  %2640 = vmatmul.mubr.msk.f32.gmra.mrb[2].mxu1 %vm24_vm0, %v3710_v60 }
 0x10d   :  { %v1596_v52 = vmul.f32 2.0, %v1501_v58  ;;  %1764 = vmax.xlane.f32.xlu0 %v1763_v28  ;;  %v1760_v3 = vsel %vm24_vm0, %v4883_v48, -inf  ;;  %v3697_v55 = vmax.f32 %v1626_v25, 0.0  ;;  %v3712_v58 = vpop.permute.xlu1 %2054 }
 0x10e   :  { %4909 = vst [vmem:[#allocation9_spill] sm:$0xff] %v3690_v53  ;;  %v1629_v19 = vsub.f32 %v1565_v22, %v1597_v5  ;;  %1761 = vmax.xlane.f32.xlu1 %v1760_v3  ;;  %v4888_v20 = vsub.f32 0.0, %v3690_v53  ;;  %4911 = vst [vmem:[#allocation11_spill] sm:$0xff] %v3712_v58  ;;  %v1567_v5 = vadd.f32 %v3486_v1, %v3489_v2  ;;  %v3734_v1 = vld [vmem:[%s4856_s0 + $0x20] sm:$0xff] }
 0x10f   :  { %4910 = vst [vmem:[#allocation10_spill] sm:$0xff] %v3697_v55  ;;  %v1628_v25 = vsub.f32 %v1564_v40, %v1596_v52  ;;  %v2729_v28 = vpop.f32.mrb[26].mxu0  ;;  %v4887_v48 = vsub.f32 0.0, %v3697_v55  ;;  %v1566_v40 = vadd.f32 %v3491_v4, %v3489_v2  ;;  %2642 = vmatprep.mubr.msk.f32.mxu1 %vm24_vm0, %v3734_v1  ;;  %v3742_v4 = vld [vmem:[%s4856_s0 + $0x28] sm:$0xff] }
 0x110   :  { %v1599_v22 = vmul.f32 2.0, %v2729_v28  ;;  %v1511_v3 = vpop.f32.mrb[27].mxu0  ;;  %v1769_v56 = vsel %vm24_vm0, %v4888_v20, -inf  ;;  %v3722_v49 = vmax.f32 %v1629_v19, 0.0  ;;  %2643 = vmatmul.mubr.msk.f32.gmra.mrb[4].mxu1 %vm24_vm0, %v3742_v4 }
 0x111   :  { %v1598_v52 = vmul.f32 2.0, %v1511_v3  ;;  %1770 = vmax.xlane.f32.xlu0 %v1769_v56  ;;  %v1766_v58 = vsel %vm24_vm0, %v4887_v48, -inf  ;;  %v3729_v59 = vmax.f32 %v1628_v25, 0.0 }
 0x112   :  { %4912 = vst [vmem:[#allocation12_spill] sm:$0xff] %v3722_v49  ;;  %v1631_v28 = vsub.f32 %v1567_v5, %v1599_v22  ;;  %1767 = vmax.xlane.f32.xlu1 %v1766_v58  ;;  %v4891_v19 = vsub.f32 0.0, %v3722_v49  ;;  %v1569_v58 = vadd.f32 %v3506_v44, %v3489_v2 }
 0x113   :  { %4913 = vst [vmem:[#allocation13_spill] sm:$0xff] %v3729_v59  ;;  %v1630_v56 = vsub.f32 %v1566_v40, %v1598_v52  ;;  %v2732_v25 = vpop.f32.mrb[28].mxu0  ;;  %v1568_v40 = vadd.f32 %v3510_v61, %v3489_v2  ;;  %v3756_v52 = vpop.permute.xlu1 %2059  ;;  %v4915_v55 = vsub.f32 0.0, %v3729_v59  ;;  %v3774_v61 = vld [vmem:[%s4856_s0 + $0x38] sm:$0xff] }
 0x114   :  { %v1601_v5 = vmul.f32 2.0, %v2732_v25  ;;  %v1521_v22 = vpop.f32.mrb[29].mxu0  ;;  %v1775_v48 = vsel %vm24_vm0, %v4891_v19, -inf  ;;  %v3752_v20 = vmax.f32 %v1631_v28, 0.0  ;;  %4914 = vst [vmem:[#allocation14_spill] sm:$0xff] %v3756_v52  ;;  %v3766_v25 = vld [vmem:[%s4856_s0 + $0x30] sm:$0xff] }
 0x115   :  { %v1600_v3 = vmul.f32 2.0, %v1521_v22  ;;  %1776 = vmax.xlane.f32.xlu0 %v1775_v48  ;;  %v1772_v53 = vsel %vm24_vm0, %v4915_v55, -inf  ;;  %v3761_v44 = vmax.f32 %v1630_v56, 0.0  ;;  %2645 = vmatprep.mubr.msk.f32.mxu1 %vm24_vm0, %v3766_v25 }
 0x116   :  { %v1633_v28 = vsub.f32 %v1569_v58, %v1601_v5  ;;  %1773 = vmax.xlane.f32.xlu1 %v1772_v53  ;;  %v4897_v19 = vsub.f32 0.0, %v3752_v20  ;;  %2646 = vmatmul.mubr.msk.f32.gmra.mrb[6].mxu1 %vm24_vm0, %v3774_v61  ;;  %v1571_v53 = vadd.f32 %v3554_v13, %v3489_v2  ;;  %v3796_v13 = vld [vmem:[%s4856_s0 + $0x40] sm:$0xff] }
 0x117   :  { %v1632_v48 = vsub.f32 %v1568_v40, %v1600_v3  ;;  %v2735_v55 = vpop.f32.mrb[30].mxu0  ;;  %v4894_v56 = vsub.f32 0.0, %v3761_v44  ;;  %v1570_v3 = vadd.f32 %v3559_v54, %v3489_v2  ;;  %2648 = vmatprep.mubr.msk.f32.mxu1 %vm24_vm0, %v3796_v13  ;;  %v3804_v54 = vld [vmem:[%s4856_s0 + $0x48] sm:$0xff]  ;;  %v2373_v2 = vsel %vm2367_vm1, %v3358_v12, 0.0 }
 0x118   :  { %v1603_v58 = vmul.f32 2.0, %v2735_v55  ;;  %v1531_v5 = vpop.f32.mrb[31].mxu0  ;;  %v1781_v22 = vsel %vm24_vm0, %v4897_v19, -inf  ;;  %v3784_v52 = vmax.f32 %v1633_v28, 0.0  ;;  %v2375_v12 = vsel %vm2367_vm1, %v3367_v21, 0.0 }
 0x119   :  { %v1602_v40 = vmul.f32 2.0, %v1531_v5  ;;  %1782 = vmax.xlane.f32.xlu0 %v1781_v22  ;;  %v1778_v59 = vsel %vm24_vm0, %v4894_v56, -inf  ;;  %v3791_v49 = vmax.f32 %v1632_v48, 0.0  ;;  %v3806_v5 = vpop.permute.xlu1 %2064 }
 0x11a   :  { %v1635_v55 = vsub.f32 %v1571_v53, %v1603_v58  ;;  %1779 = vmax.xlane.f32.xlu1 %v1778_v59  ;;  %v4895_v28 = vsub.f32 0.0, %v3784_v52  ;;  %4916 = vst [vmem:[#allocation15_spill] sm:$0xff] %v3806_v5  ;;  %2649 = vmatmul.mubr.msk.f32.gmra.mrb[8].mxu1 %vm24_vm0, %v3804_v54 }
 0x11b   :  { %v1634_v48 = vsub.f32 %v1570_v3, %v1602_v40  ;;  %v4896_v22 = vsub.f32 0.0, %v3791_v49  ;;  %v42_v3 = vld [vmem:[%s4856_s0 + $0x50] sm:$0xff]  ;;  %v43_v40 = vld [vmem:[%s4856_s0 + $0x58] sm:$0xff] }
 0x11c   :  { %v1787_v59 = vsel %vm24_vm0, %v4895_v28, -inf  ;;  %v3814_v53 = vmax.f32 %v1635_v55, 0.0  ;;  %2651 = vmatprep.mubr.msk.f32.mxu1 %vm24_vm0, %v42_v3 }
 0x11d   :  { %v3816_v58 = vmax.f32 %v1634_v48, 0.0  ;;  %1788 = vmax.xlane.f32.xlu0 %v1787_v59  ;;  %v1784_v56 = vsel %vm24_vm0, %v4896_v22, -inf  ;;  %v2371_v48 = vsel %vm2367_vm1, %v3348_v16, 0.0  ;;  %v44_v22 = vld [vmem:[%s4856_s0 + $0x60] sm:$0xff]  ;;  %v45_v16 = vld [vmem:[%s4856_s0 + $0x68] sm:$0xff] }
 0x11e   :  { %1785 = vmax.xlane.f32.xlu1 %v1784_v56  ;;  %v4898_v28 = vsub.f32 0.0, %v3814_v53  ;;  %2652 = vmatmul.mubr.msk.f32.gmra.mrb[10].mxu1 %vm24_vm0, %v43_v40  ;;  %v3839_v56 = vpop.permute.xlu1 %2069 }
 0x11f   :  { %4917 = vst [vmem:[#allocation16_spill] sm:$0xff] %v3816_v58  ;;  %v4901_v55 = vsub.f32 0.0, %v3816_v58  ;;  %4918 = vst [vmem:[#allocation17_spill] sm:$0xff] %v3839_v56  ;;  %2654 = vmatprep.mubr.msk.f32.mxu1 %vm24_vm0, %v44_v22  ;;  %v3876_v58 = vmul.f32 1.4142135, %v3710_v60  ;;  %v2379_v60 = vsel %vm2367_vm1, %v3388_v26, 0.0 }
 0x120   :  { %v1793_v59 = vsel %vm24_vm0, %v4898_v28, -inf  ;;  %v2372_v28 = vadd.f32 %v2371_v48, %v3242_v27  ;;  %v3865_v48 = vmul.f32 1.4142135, %v3677_v46  ;;  %v3883_v46 = vmul.f32 1.4142135, %v3734_v1 }
 0x121   :  { %1794 = vmax.xlane.f32.xlu0 %v1793_v59  ;;  %v1790_v19 = vsel %vm24_vm0, %v4901_v55, -inf  ;;  %v3853_v59 = vmul.f32 1.4142135, %v3661_v43  ;;  %v46_v55 = vld [vmem:[%s4856_s0 + $0x70] sm:$0xff]  ;;  %v3871_v43 = vmul.f32 1.4142135, %v3702_v50 }
 0x122   :  { %1791 = vmax.xlane.f32.xlu1 %v1790_v19  ;;  %2655 = vmatmul.mubr.msk.f32.gmra.mrb[12].mxu1 %vm24_vm0, %v45_v16  ;;  %v47_v19 = vld [vmem:[%s4856_s0 + $0x78] sm:$0xff]  ;;  %v2374_v5 = vadd.f32 %v2373_v2, %v2372_v28  ;;  %v3862_v27 = vpop.permute.xlu1 %2074  ;;  %v2377_v2 = vsel %vm2367_vm1, %v3376_v23, 0.0  ;;  %v3890_v28 = vmul.f32 1.4142135, %v3742_v4  ;;  %v3900_v1 = vmul.f32 1.4142135, %v3766_v25 }
 0x123   :  { %2657 = vmatprep.mubr.msk.f32.mxu1 %vm24_vm0, %v46_v55  ;;  %4919 = vst [vmem:[#allocation18_spill] sm:$0xff] %v3862_v27  ;;  %v1058_v23 = vld [vmem:[%s4860_s4 + $0xf8] sm:$0xff]  ;;  %v2381_v26 = vsel %vm2367_vm1, %v3400_v31, 0.0  ;;  %v3916_v25 = vmul.f32 1.4142135, %v3796_v13 }
 0x124   :  { %v2376_v56 = vadd.f32 %v2375_v12, %v2374_v5  ;;  %v3904_v5 = vpop.permute.xlu0 %2139  ;;  %v3909_v12 = vmul.f32 1.4142135, %v3774_v61  ;;  %v2383_v61 = vsel %vm2367_vm1, %v3426_v37, 0.0 }
 0x126   :  { %2658 = vmatmul.mubr.msk.f32.gmra.mrb[14].mxu1 %vm24_vm0, %v47_v19  ;;  %v3887_v21 = vpop.permute.xlu1 %2079  ;;  %v2378_v50 = vadd.f32 %v2377_v2, %v2376_v56 }
 0x127   :  { %2662 = vmatprep.mubr.msk.f32.mxu1 %vm24_vm0, %v3853_v59  ;;  %4920 = vst [vmem:[#allocation19_spill] sm:$0xff] %v3887_v21 }
 0x128   :  { %v2380_v4 = vadd.f32 %v2379_v60, %v2378_v50  ;;  %v3921_v50 = vmul.f32 1.4142135, %v3804_v54  ;;  %v3927_v60 = vpop.permute.xlu0 %2144  ;;  %v2385_v54 = vsel %vm2367_vm1, %v3436_v39, 0.0 }
 0x12a   :  { %2663 = vmatmul.mubr.msk.f32.vlgmr.msra.gmra.mrb[16].mxu1 %vm24_vm0, %v3865_v48  ;;  %v3906_v56 = vpop.permute.xlu1 %2164  ;;  %v2382_v2 = vadd.f32 %v2381_v26, %v2380_v4  ;;  %v3935_v4 = vmul.f32 1.4142135, %v43_v40  ;;  %v3941_v26 = vmul.f32 1.4142135, %v44_v22  ;;  %v2387_v40 = vsel %vm2367_vm1, %v3405_v32, 0.0 }
 0x12b   :  { %2665 = vmatprep.mubr.msk.f32.mxu1 %vm24_vm0, %v3871_v43  ;;  %4921 = vst [vmem:[#allocation20_spill] sm:$0xff] %v3906_v56  ;;  %v3959_v22 = vmul.f32 1.4142135, %v47_v19  ;;  %v2391_v19 = vsel %vm2367_vm1, %v3421_v36, 0.0  ;;  %v3993_v36 = vld [vmem:[%s4860_s4 + $0x70] sm:$0xff] }
 0x12c   :  { %v2384_v13 = vadd.f32 %v2383_v61, %v2382_v2  ;;  %v3945_v37 = vpop.permute.xlu0 %2149  ;;  %v3955_v2 = vmul.f32 1.4142135, %v46_v55 }
 0x12e   :  { %2666 = vmatmul.mubr.msk.f32.gmra.mrb[18].mxu1 %vm24_vm0, %v3876_v58  ;;  %v3933_v31 = vpop.permute.xlu1 %2169 }
 0x12f   :  { %2668 = vmatprep.mubr.msk.f32.mxu1 %vm24_vm0, %v3883_v46  ;;  %4922 = vst [vmem:[#allocation21_spill] sm:$0xff] %v3933_v31  ;;  %v3949_v31 = vmul.f32 1.4142135, %v45_v16  ;;  %v2389_v16 = vsel %vm2367_vm1, %v3445_v42, 0.0  ;;  %v2393_v42 = vsel %vm2367_vm1, %v3454_v45, 0.0  ;;  %v2395_v45 = vsel %vm2367_vm1, %v3993_v36, 0.0 }
 0x130   :  { %v3965_v61 = vpop.permute.xlu0 %2154 }
 0x131   :  { %4924 = vst [vmem:[#allocation23_spill] sm:$0xff] %v3965_v61 }
 0x132   :  { %2669 = vmatmul.mubr.msk.f32.gmra.mrb[20].mxu1 %vm24_vm0, %v3890_v28  ;;  %v3947_v56 = vpop.permute.xlu1 %2089 }
 0x133   :  { %2209 = vperm.xlu1 %2782, %v1058_v23   ;;  %2671 = vmatprep.mubr.msk.f32.mxu1 %vm24_vm0, %v3900_v1  ;;  %v3929_v23 = vmul.f32 1.4142135, %v42_v3  ;;  %v2386_v3 = vadd.f32 %v2385_v54, %v2384_v13  ;;  %4923 = vst [vmem:[#allocation22_spill] sm:$0xff] %v3947_v56 }
 0x134   :  { %v3975_v13 = vpop.permute.xlu0 %2159 }
 0x135   :  { %v2388_v39 = vadd.f32 %v2387_v40, %v2386_v3  ;;  %4926 = vst [vmem:[#allocation25_spill] sm:$0xff] %v3975_v13 }
 0x136   :  { %2672 = vmatmul.mubr.msk.f32.gmra.mrb[22].mxu1 %vm24_vm0, %v3909_v12  ;;  %v3969_v32 = vpop.permute.xlu1 %2174 }
 0x137   :  { %2674 = vmatprep.mubr.msk.f32.mxu1 %vm24_vm0, %v3916_v25  ;;  %4925 = vst [vmem:[#allocation24_spill] sm:$0xff] %v3969_v32  ;;  %v2390_v55 = vadd.f32 %v2389_v16, %v2388_v39  ;;  %v3988_v39 = vld [vmem:[%s4860_s4 + $0x78] sm:$0xff] }
 0x138   :  { %v3981_v56 = vpop.permute.xlu0 %2084  ;;  %v2397_v16 = vsel %vm2367_vm1, %v3988_v39, 0.0 }
 0x139   :  { %v2392_v54 = vadd.f32 %v2391_v19, %v2390_v55  ;;  %4928 = vst [vmem:[#allocation27_spill] sm:$0xff] %v3981_v56  ;;  %v2399_v19 = vsel %vm2367_vm1, %v3335_v14, 0.0 }
 0x13a   :  { %2675 = vmatmul.mubr.msk.f32.gmra.mrb[24].mxu1 %vm24_vm0, %v3921_v50  ;;  %v3977_v3 = vpop.permute.xlu1 %2179 }
 0x13b   :  { %2677 = vmatprep.mubr.msk.f32.mxu1 %vm24_vm0, %v3929_v23  ;;  %4927 = vst [vmem:[#allocation26_spill] sm:$0xff] %v3977_v3  ;;  %v2394_v40 = vadd.f32 %v2393_v42, %v2392_v54  ;;  %v2401_v42 = vsel %vm2367_vm1, %v3342_v15, 0.0 }
 0x13c   :  { %v4003_v3 = vpop.permute.xlu0 %2184 }
 0x13d   :  { %v2396_v55 = vadd.f32 %v2395_v45, %v2394_v40  ;;  %4930 = vst [vmem:[#allocation29_spill] sm:$0xff] %v4003_v3 }
 0x13e   :  { %2678 = vmatmul.mubr.msk.f32.gmra.mrb[26].mxu1 %vm24_vm0, %v3935_v4  ;;  %v3983_v61 = vpop.permute.xlu1 %2094 }
 0x13f   :  { %2680 = vmatprep.mubr.msk.f32.mxu1 %vm24_vm0, %v3941_v26  ;;  %4929 = vst [vmem:[#allocation28_spill] sm:$0xff] %v3983_v61  ;;  %v2398_v54 = vadd.f32 %v2397_v16, %v2396_v55 }
 0x140   :  { %v4009_v13 = vpop.permute.xlu0 %2104 }
 0x141   :  { %v2400_v61 = vadd.f32 %v2399_v19, %v2398_v54  ;;  %4933 = vst [vmem:[#allocation32_spill] sm:$0xff] %v4009_v13 }
 0x142   :  { %2681 = vmatmul.mubr.msk.f32.gmra.mrb[28].mxu1 %vm24_vm0, %v3949_v31  ;;  %v4005_v32 = vpop.permute.xlu1 %2099 }
 0x143   :  { %2683 = vmatprep.mubr.msk.f32.mxu1 %vm24_vm0, %v3955_v2  ;;  %4931 = vst [vmem:[#allocation30_spill] sm:$0xff] %v4005_v32  ;;  %v4007_v56 = vadd.f32 %v2401_v42, %v2400_v61  ;;  %v4941_v61 = vsub.f32 0.0, %v3500_v33  ;;  %v4942_v42 = vsub.f32 0.0, %v3503_v38 }
 0x144   :  { %v4013_v21 = vpop.permute.xlu0 %2194 }
 0x145   :  { %4932 = vst [vmem:[#allocation31_spill] sm:$0xff] %v4007_v56  ;;  %4935 = vst [vmem:[#allocation34_spill] sm:$0xff] %v4013_v21 }
 0x146   :  { %2684 = vmatmul.mubr.msk.f32.gmra.mrb[30].mxu1 %vm24_vm0, %v3959_v22  ;;  %v4011_v27 = vpop.permute.xlu1 %2189 }
 0x147   :  { %4934 = vst [vmem:[#allocation33_spill] sm:$0xff] %v4011_v27 }
 0x148   :  { %v4017_v14 = vpop.permute.xlu0 %2114 }
 0x149   :  { %4937 = vst [vmem:[#allocation36_spill] sm:$0xff] %v4017_v14  ;;  %v4943_v14 = vsub.f32 0.0, %v3515_v8 }
 0x14a   :  { %v4015_v40 = vpop.permute.xlu1 %2109 }
 0x14b   :  { %4936 = vst [vmem:[#allocation35_spill] sm:$0xff] %v4015_v40 }
 0x14c   :  { %v4021_v15 = vpop.permute.xlu0 %2204 }
 0x14d   :  { %4939 = vst [vmem:[#allocation38_spill] sm:$0xff] %v4021_v15  ;;  %v4944_v15 = vsub.f32 0.0, %v3521_v18 }
 0x14e   :  { %v4019_v16 = vpop.permute.xlu1 %2199 }
 0x14f   :  { %4938 = vst [vmem:[#allocation37_spill] sm:$0xff] %v4019_v16 }
 0x152   :  { %v4023_v45 = vpop.permute.xlu1 %2119 }
 0x153   :  { %4940 = vst [vmem:[#allocation39_spill] sm:$0xff] %v4023_v45 }
 0x172   :  { %v1705_v55 = vpop.xlane.xlu0 %1704 }
 0x173   :  { %v1797_v19 = vsub.f32 %v4941_v61, %v1705_v55  ;;  %v1702_v54 = vpop.xlane.xlu1 %1701  ;;  %v4945_v55 = vsub.f32 0.0, %v3529_v41 }
 0x174   :  { %v1796_v56 = vsub.f32 %v4942_v42, %v1702_v54  ;;  %v4949_v54 = vsub.f32 0.0, %v3564_v57 }
 0x175   :  { %v1830_v27 = vmul.f32 1.442695, %v1797_v19 }
 0x176   :  { %v1828_v21 = vmul.f32 1.442695, %v1796_v56  ;;  %v1711_v13 = vpop.xlane.xlu0 %1710  ;;  %v4946_v56 = vsub.f32 0.0, %v3535_v7 }
 0x177   :  { %2784 = vpow2.f32 %v1830_v27  ;;  %v1799_v3 = vsub.f32 %v4943_v14, %v1711_v13  ;;  %v1708_v16 = vpop.xlane.xlu1 %1707 }
 0x178   :  { %2786 = vpow2.f32 %v1828_v21  ;;  %v1798_v45 = vsub.f32 %v4944_v15, %v1708_v16  ;;  %v4947_v21 = vsub.f32 0.0, %v3544_v24 }
 0x179   :  { %v1834_v40 = vmul.f32 1.442695, %v1799_v3  ;;  %v4948_v3 = vsub.f32 0.0, %v3551_v51 }
 0x17a   :  { %v1832_v32 = vmul.f32 1.442695, %v1798_v45  ;;  %v1717_v33 = vpop.xlane.xlu0 %1716 }
 0x17b   :  { %2788 = vpow2.f32 %v1834_v40  ;;  %v1801_v38 = vsub.f32 %v4945_v55, %v1717_v33  ;;  %v1714_v61 = vpop.xlane.xlu1 %1713  ;;  %v4950_v33 = vsub.f32 0.0, %v3571_v11 }
 0x17c   :  { %2790 = vpow2.f32 %v1832_v32  ;;  %v1800_v27 = vsub.f32 %v4946_v56, %v1714_v61 }
 0x17d   :  { %v1838_v19 = vmul.f32 1.442695, %v1801_v38 }
 0x17e   :  { %v1836_v8 = vmul.f32 1.442695, %v1800_v27  ;;  %v1723_v13 = vpop.xlane.xlu0 %1722 }
 0x17f   :  { %2792 = vpow2.f32 %v1838_v19  ;;  %v1803_v18 = vsub.f32 %v4947_v21, %v1723_v13  ;;  %v1720_v14 = vpop.xlane.xlu1 %1719 }
 0x180   :  { %2794 = vpow2.f32 %v1836_v8  ;;  %v1802_v40 = vsub.f32 %v4948_v3, %v1720_v14  ;;  %v4951_v8 = vsub.f32 0.0, %v3579_v10 }
 0x181   :  { %v4041_v16 = vpop.eup %2784  ;;  %v1842_v41 = vmul.f32 1.442695, %v1803_v18  ;;  %v4952_v18 = vsub.f32 0.0, %v3585_v30 }
 0x182   :  { %v4043_v15 = vpop.eup %2786  ;;  %v1840_v32 = vmul.f32 1.442695, %v1802_v40  ;;  %v1729_v7 = vpop.xlane.xlu0 %1728  ;;  %v1895_v45 = vsel %vm24_vm0, %v4041_v16, 0.0 }
 0x183   :  { %2796 = vpow2.f32 %v1842_v41  ;;  %v1805_v24 = vsub.f32 %v4949_v54, %v1729_v7  ;;  %v1726_v42 = vpop.xlane.xlu1 %1725  ;;  %1896 = vadd.xlane.f32.xlu0 %v1895_v45  ;;  %v1892_v51 = vsel %vm24_vm0, %v4043_v15, 0.0  ;;  %v4953_v45 = vsub.f32 0.0, %v3593_v62 }
 0x184   :  { %2798 = vpow2.f32 %v1840_v32  ;;  %v1804_v55 = vsub.f32 %v4950_v33, %v1726_v42  ;;  %1893 = vadd.xlane.f32.xlu1 %v1892_v51  ;;  %v4954_v42 = vsub.f32 0.0, %v3599_v9 }
 0x185   :  { %v4053_v38 = vpop.eup %2788  ;;  %v1846_v61 = vmul.f32 1.442695, %v1805_v24 }
 0x186   :  { %v4055_v56 = vpop.eup %2790  ;;  %v1844_v27 = vmul.f32 1.442695, %v1804_v55  ;;  %v1735_v19 = vpop.xlane.xlu0 %1734  ;;  %v1901_v57 = vsel %vm24_vm0, %v4053_v38, 0.0 }
 0x187   :  { %2800 = vpow2.f32 %v1846_v61  ;;  %v1807_v13 = vsub.f32 %v4951_v8, %v1735_v19  ;;  %v1732_v21 = vpop.xlane.xlu1 %1731  ;;  %1902 = vadd.xlane.f32.xlu0 %v1901_v57  ;;  %v1898_v11 = vsel %vm24_vm0, %v4055_v56, 0.0  ;;  %v4955_v57 = vsub.f32 0.0, %v3608_v17 }
 0x188   :  { %2802 = vpow2.f32 %v1844_v27  ;;  %v1806_v14 = vsub.f32 %v4952_v18, %v1732_v21  ;;  %1899 = vadd.xlane.f32.xlu1 %v1898_v11  ;;  %v4956_v21 = vsub.f32 0.0, %v3615_v29 }
 0x189   :  { %v4065_v3 = vpop.eup %2792  ;;  %v1850_v40 = vmul.f32 1.442695, %v1807_v13 }
 0x18a   :  { %v4067_v41 = vpop.eup %2794  ;;  %v1848_v32 = vmul.f32 1.442695, %v1806_v14  ;;  %v1741_v7 = vpop.xlane.xlu0 %1740  ;;  %v1907_v10 = vsel %vm24_vm0, %v4065_v3, 0.0 }
 0x18b   :  { %2804 = vpow2.f32 %v1850_v40  ;;  %v1809_v54 = vsub.f32 %v4953_v45, %v1741_v7  ;;  %v1738_v24 = vpop.xlane.xlu1 %1737  ;;  %1908 = vadd.xlane.f32.xlu0 %v1907_v10  ;;  %v1904_v30 = vsel %vm24_vm0, %v4067_v41, 0.0  ;;  %v4957_v10 = vsub.f32 0.0, %v3624_v34 }
 0x18c   :  { %2806 = vpow2.f32 %v1848_v32  ;;  %v1808_v51 = vsub.f32 %v4954_v42, %v1738_v24  ;;  %1905 = vadd.xlane.f32.xlu1 %v1904_v30  ;;  %v4958_v24 = vsub.f32 0.0, %v3631_v0 }
 0x18d   :  { %v4077_v33 = vpop.eup %2796  ;;  %v1854_v55 = vmul.f32 1.442695, %v1809_v54 }
 0x18e   :  { %v4079_v61 = vpop.eup %2798  ;;  %v1852_v27 = vmul.f32 1.442695, %v1808_v51  ;;  %v1747_v19 = vpop.xlane.xlu0 %1746  ;;  %v1913_v62 = vsel %vm24_vm0, %v4077_v33, 0.0 }
 0x18f   :  { %2808 = vpow2.f32 %v1854_v55  ;;  %v1811_v8 = vsub.f32 %v4955_v57, %v1747_v19  ;;  %v1744_v13 = vpop.xlane.xlu1 %1743  ;;  %1914 = vadd.xlane.f32.xlu0 %v1913_v62  ;;  %v1910_v9 = vsel %vm24_vm0, %v4079_v61, 0.0  ;;  %v4959_v62 = vsub.f32 0.0, %v3640_v35 }
 0x190   :  { %2810 = vpow2.f32 %v1852_v27  ;;  %v1810_v11 = vsub.f32 %v4956_v21, %v1744_v13  ;;  %1911 = vadd.xlane.f32.xlu1 %v1910_v9  ;;  %v4960_v13 = vsub.f32 0.0, %v3647_v63 }
 0x191   :  { %v4089_v18 = vpop.eup %2800  ;;  %v1858_v14 = vmul.f32 1.442695, %v1811_v8 }
 0x192   :  { %v4091_v40 = vpop.eup %2802  ;;  %v1856_v32 = vmul.f32 1.442695, %v1810_v11  ;;  %v1753_v7 = vpop.xlane.xlu0 %1752  ;;  %v1919_v17 = vsel %vm24_vm0, %v4089_v18, 0.0 }
 0x193   :  { %2812 = vpow2.f32 %v1858_v14  ;;  %v1813_v45 = vsub.f32 %v4957_v10, %v1753_v7  ;;  %v1750_v54 = vpop.xlane.xlu1 %1749  ;;  %1920 = vadd.xlane.f32.xlu0 %v1919_v17  ;;  %v1916_v29 = vsel %vm24_vm0, %v4091_v40, 0.0  ;;  %v4961_v17 = vsub.f32 0.0, %v3656_v47 }
 0x194   :  { %2814 = vpow2.f32 %v1856_v32  ;;  %v1812_v30 = vsub.f32 %v4958_v24, %v1750_v54  ;;  %1917 = vadd.xlane.f32.xlu1 %v1916_v29  ;;  %v4962_v54 = vsub.f32 0.0, %v3670_v6 }
 0x195   :  { %v4101_v42 = vpop.eup %2804  ;;  %v1862_v51 = vmul.f32 1.442695, %v1813_v45 }
 0x196   :  { %v4103_v55 = vpop.eup %2806  ;;  %v1860_v27 = vmul.f32 1.442695, %v1812_v30  ;;  %v1759_v19 = vpop.xlane.xlu0 %1758  ;;  %v1925_v34 = vsel %vm24_vm0, %v4101_v42, 0.0 }
 0x197   :  { %2816 = vpow2.f32 %v1862_v51  ;;  %v1815_v57 = vsub.f32 %v4959_v62, %v1759_v19  ;;  %v1756_v8 = vpop.xlane.xlu1 %1755  ;;  %1926 = vadd.xlane.f32.xlu0 %v1925_v34  ;;  %v1922_v0 = vsel %vm24_vm0, %v4103_v55, 0.0  ;;  %v4963_v34 = vld [vmem:[#allocation9_spill] sm:$0xff] }
 0x198   :  { %2818 = vpow2.f32 %v1860_v27  ;;  %v1814_v9 = vsub.f32 %v4960_v13, %v1756_v8  ;;  %1923 = vadd.xlane.f32.xlu1 %v1922_v0  ;;  %v4964_v62 = vsub.f32 0.0, %v4963_v34  ;;  %v4965_v0 = vld [vmem:[#allocation10_spill] sm:$0xff] }
 0x199   :  { %v4113_v21 = vpop.eup %2808  ;;  %v1866_v11 = vmul.f32 1.442695, %v1815_v57  ;;  %v4966_v13 = vsub.f32 0.0, %v4965_v0 }
 0x19a   :  { %v4115_v14 = vpop.eup %2810  ;;  %v1864_v32 = vmul.f32 1.442695, %v1814_v9  ;;  %v1765_v7 = vpop.xlane.xlu0 %1764  ;;  %v1931_v35 = vsel %vm24_vm0, %v4113_v21, 0.0 }
 0x19b   :  { %2820 = vpow2.f32 %v1866_v11  ;;  %v1817_v10 = vsub.f32 %v4961_v17, %v1765_v7  ;;  %v1762_v45 = vpop.xlane.xlu1 %1761  ;;  %v1928_v63 = vsel %vm24_vm0, %v4115_v14, 0.0 }
 0x19c   :  { %2822 = vpow2.f32 %v1864_v32  ;;  %v1816_v29 = vsub.f32 %v4962_v54, %v1762_v45  ;;  %1929 = vadd.xlane.f32.xlu0 %v1928_v63  ;;  %1932 = vadd.xlane.f32.xlu1 %v1931_v35  ;;  %v4967_v45 = vld [vmem:[#allocation12_spill] sm:$0xff] }
 0x19d   :  { %v4125_v24 = vpop.eup %2812  ;;  %v1870_v30 = vmul.f32 1.442695, %v1817_v10  ;;  %v4968_v63 = vsub.f32 0.0, %v4967_v45 }
 0x19e   :  { %v4127_v51 = vpop.eup %2814  ;;  %v1868_v27 = vmul.f32 1.442695, %v1816_v29  ;;  %v1771_v19 = vpop.xlane.xlu0 %1770  ;;  %v1937_v47 = vsel %vm24_vm0, %v4125_v24, 0.0 }
 0x19f   :  { %2824 = vpow2.f32 %v1870_v30  ;;  %v1819_v57 = vsub.f32 %v4964_v62, %v1771_v19  ;;  %v1768_v8 = vpop.xlane.xlu1 %1767  ;;  %v1934_v6 = vsel %vm24_vm0, %v4127_v51, 0.0 }
 0x1a0   :  { %2826 = vpow2.f32 %v1868_v27  ;;  %v1818_v9 = vsub.f32 %v4966_v13, %v1768_v8  ;;  %1935 = vadd.xlane.f32.xlu0 %v1934_v6  ;;  %1938 = vadd.xlane.f32.xlu1 %v1937_v47  ;;  %v4969_v27 = vld [vmem:[#allocation13_spill] sm:$0xff]  ;;  %v4971_v13 = vsub.f32 0.0, %v3752_v20 }
 0x1a1   :  { %v4137_v11 = vpop.eup %2816  ;;  %v1874_v32 = vmul.f32 1.442695, %v1819_v57  ;;  %v4970_v19 = vsub.f32 0.0, %v4969_v27  ;;  %v4973_v27 = vsub.f32 0.0, %v3784_v52 }
 0x1a2   :  { %v4139_v7 = vpop.eup %2818  ;;  %v1872_v35 = vmul.f32 1.442695, %v1818_v9  ;;  %v1777_v17 = vpop.xlane.xlu0 %1776  ;;  %v1943_v10 = vsel %vm24_vm0, %v4137_v11, 0.0 }
 0x1a3   :  { %2828 = vpow2.f32 %v1874_v32  ;;  %v1821_v54 = vsub.f32 %v4968_v63, %v1777_v17  ;;  %v1774_v29 = vpop.xlane.xlu1 %1773  ;;  %v1940_v30 = vsel %vm24_vm0, %v4139_v7, 0.0  ;;  %v4972_v17 = vsub.f32 0.0, %v3761_v44 }
 0x1a4   :  { %2830 = vpow2.f32 %v1872_v35  ;;  %v1820_v47 = vsub.f32 %v4970_v19, %v1774_v29  ;;  %1941 = vadd.xlane.f32.xlu1 %v1940_v30  ;;  %1944 = vadd.xlane.f32.xlu0 %v1943_v10 }
 0x1a5   :  { %v4149_v34 = vpop.eup %2820  ;;  %v1878_v62 = vmul.f32 1.442695, %v1821_v54 }
 0x1a6   :  { %v4151_v57 = vpop.eup %2822  ;;  %v1876_v8 = vmul.f32 1.442695, %v1820_v47  ;;  %v1783_v6 = vpop.xlane.xlu0 %1782  ;;  %v1949_v0 = vsel %vm24_vm0, %v4149_v34, 0.0 }
 0x1a7   :  { %2832 = vpow2.f32 %v1878_v62  ;;  %v1823_v9 = vsub.f32 %v4971_v13, %v1783_v6  ;;  %v1780_v32 = vpop.xlane.xlu1 %1779  ;;  %v1946_v35 = vsel %vm24_vm0, %v4151_v57, 0.0  ;;  %v4974_v62 = vsub.f32 0.0, %v3791_v49 }
 0x1a8   :  { %2834 = vpow2.f32 %v1876_v8  ;;  %v1822_v10 = vsub.f32 %v4972_v17, %v1780_v32  ;;  %1947 = vadd.xlane.f32.xlu1 %v1946_v35  ;;  %1950 = vadd.xlane.f32.xlu0 %v1949_v0  ;;  %v4975_v35 = vsub.f32 0.0, %v3814_v53 }
 0x1a9   :  { %v4161_v45 = vpop.eup %2824  ;;  %v1882_v63 = vmul.f32 1.442695, %v1823_v9 }
 0x1aa   :  { %v4163_v54 = vpop.eup %2826  ;;  %v1880_v29 = vmul.f32 1.442695, %v1822_v10  ;;  %v1789_v30 = vpop.xlane.xlu0 %1788  ;;  %v1955_v20 = vsel %vm24_vm0, %v4161_v45, 0.0 }
 0x1ab   :  { %2836 = vpow2.f32 %v1882_v63  ;;  %v1825_v19 = vsub.f32 %v4973_v27, %v1789_v30  ;;  %v1786_v47 = vpop.xlane.xlu1 %1785  ;;  %v1952_v44 = vsel %vm24_vm0, %v4163_v54, 0.0  ;;  %v4976_v63 = vld [vmem:[#allocation16_spill] sm:$0xff] }
 0x1ac   :  { %2838 = vpow2.f32 %v1880_v29  ;;  %v1824_v8 = vsub.f32 %v4974_v62, %v1786_v47  ;;  %1953 = vadd.xlane.f32.xlu1 %v1952_v44  ;;  %1956 = vadd.xlane.f32.xlu0 %v1955_v20  ;;  %v4977_v29 = vsub.f32 0.0, %v4976_v63 }
 0x1ad   :  { %v4173_v6 = vpop.eup %2828  ;;  %v1886_v0 = vmul.f32 1.442695, %v1825_v19 }
 0x1ae   :  { %v4175_v13 = vpop.eup %2830  ;;  %v1884_v9 = vmul.f32 1.442695, %v1824_v8  ;;  %v1795_v32 = vpop.xlane.xlu0 %1794  ;;  %v1961_v52 = vsel %vm24_vm0, %v4173_v6, 0.0 }
 0x1af   :  { %2840 = vpow2.f32 %v1886_v0  ;;  %v1827_v17 = vsub.f32 %v4975_v35, %v1795_v32  ;;  %v1792_v10 = vpop.xlane.xlu1 %1791  ;;  %v1958_v49 = vsel %vm24_vm0, %v4175_v13, 0.0 }
 0x1b0   :  { %2842 = vpow2.f32 %v1884_v9  ;;  %v1826_v30 = vsub.f32 %v4977_v29, %v1792_v10  ;;  %1959 = vadd.xlane.f32.xlu1 %v1958_v49  ;;  %1962 = vadd.xlane.f32.xlu0 %v1961_v52 }
 0x1b1   :  { %v4185_v20 = vpop.eup %2832  ;;  %v1890_v27 = vmul.f32 1.442695, %v1827_v17 }
 0x1b2   :  { %v4187_v19 = vpop.eup %2834  ;;  %v1888_v47 = vmul.f32 1.442695, %v1826_v30  ;;  %v1967_v53 = vsel %vm24_vm0, %v4185_v20, 0.0 }
 0x1b3   :  { %2844 = vpow2.f32 %v1890_v27  ;;  %v1964_v44 = vsel %vm24_vm0, %v4187_v19, 0.0 }
 0x1b4   :  { %2846 = vpow2.f32 %v1888_v47  ;;  %1965 = vadd.xlane.f32.xlu1 %v1964_v44  ;;  %1968 = vadd.xlane.f32.xlu0 %v1967_v53 }
 0x1b5   :  { %v4193_v62 = vpop.eup %2836 }
 0x1b6   :  { %v4195_v8 = vpop.eup %2838  ;;  %v1973_v0 = vsel %vm24_vm0, %v4193_v62, 0.0 }
 0x1b7   :  { %v1970_v9 = vsel %vm24_vm0, %v4195_v8, 0.0 }
 0x1b8   :  { %1971 = vadd.xlane.f32.xlu1 %v1970_v9  ;;  %1974 = vadd.xlane.f32.xlu0 %v1973_v0 }
 0x1b9   :  { %v4201_v32 = vpop.eup %2840 }
 0x1ba   :  { %v4203_v52 = vpop.eup %2842  ;;  %v1979_v35 = vsel %vm24_vm0, %v4201_v32, 0.0 }
 0x1bb   :  { %v1976_v17 = vsel %vm24_vm0, %v4203_v52, 0.0 }
 0x1bc   :  { %1977 = vadd.xlane.f32.xlu1 %v1976_v17  ;;  %1980 = vadd.xlane.f32.xlu0 %v1979_v35 }
 0x1bd   :  { %v4209_v10 = vpop.eup %2844 }
 0x1be   :  { %v4211_v49 = vpop.eup %2846  ;;  %v1985_v63 = vsel %vm24_vm0, %v4209_v10, 0.0 }
 0x1bf   :  { %v1982_v29 = vsel %vm24_vm0, %v4211_v49, 0.0 }
 0x1c0   :  { %1983 = vadd.xlane.f32.xlu1 %v1982_v29  ;;  %1986 = vadd.xlane.f32.xlu0 %v1985_v63 }
 0x1d1   :  { %2129 = vperm.xlu1 %2782, %v3988_v39   ;;  %v409_v39 = vmul.f32 %v3865_v48, %v3865_v48 }
 0x1d3   :  { %v427_v29 = vsel %vm24_vm0, %v409_v39, 0.0  ;;  %v414_v39 = vmul.f32 %v3900_v1, %v3900_v1 }
 0x1d6   :  { %2124 = vperm.xlu0 %2783, %v3993_v36   ;;  %v408_v36 = vmul.f32 %v3853_v59, %v3853_v59 }
 0x1db   :  { %v4219_v30 = vpop.f32.mrb[0].mxu1 }
 0x1dc   :  { %4978 = vst [vmem:[#allocation9_spill] sm:$0xff] %v4219_v30  ;;  %v4221_v27 = vpop.f32.mrb[1].mxu1 }
 0x1dd   :  { %4979 = vst [vmem:[#allocation10_spill] sm:$0xff] %v4221_v27 }
 0x1df   :  { %v4223_v47 = vpop.f32.mrb[2].mxu1 }
 0x1e0   :  { %4980 = vst [vmem:[#allocation12_spill] sm:$0xff] %v4223_v47  ;;  %v4225_v53 = vpop.f32.mrb[3].mxu1 }
 0x1e1   :  { %4981 = vst [vmem:[#allocation13_spill] sm:$0xff] %v4225_v53 }
 0x1e3   :  { %v4227_v44 = vpop.f32.mrb[4].mxu1 }
 0x1e4   :  { %4982 = vst [vmem:[#allocation16_spill] sm:$0xff] %v4227_v44  ;;  %v4229_v0 = vpop.f32.mrb[5].mxu1  ;;  %v424_v44 = vsel %vm24_vm0, %v408_v36, 0.0  ;;  %v411_v36 = vmul.f32 %v3876_v58, %v3876_v58 }
 0x1e5   :  { %4983 = vst [vmem:[#allocation40_spill] sm:$0xff] %v4229_v0  ;;  %v412_v0 = vmul.f32 %v3883_v46, %v3883_v46 }
 0x1e7   :  { %v436_v59 = vsel %vm24_vm0, %v412_v0, 0.0  ;;  %v416_v0 = vmul.f32 %v3916_v25, %v3916_v25 }
 0x1e9   :  { %v4231_v9 = vpop.f32.mrb[6].mxu1  ;;  %v448_v58 = vsel %vm24_vm0, %v416_v0, 0.0  ;;  %v417_v0 = vmul.f32 %v3921_v50, %v3921_v50 }
 0x1ea   :  { %4984 = vst [vmem:[#allocation41_spill] sm:$0xff] %v4231_v9  ;;  %v4233_v35 = vpop.f32.mrb[7].mxu1  ;;  %v410_v9 = vmul.f32 %v3871_v43, %v3871_v43  ;;  %v442_v43 = vsel %vm24_vm0, %v414_v39, 0.0  ;;  %v415_v39 = vmul.f32 %v3909_v12, %v3909_v12 }
 0x1eb   :  { %4985 = vst [vmem:[#allocation42_spill] sm:$0xff] %v4233_v35 }
 0x1ed   :  { %v4239_v17 = vpop.f32.mrb[8].mxu1 }
 0x1ee   :  { %4986 = vst [vmem:[#allocation43_spill] sm:$0xff] %v4239_v17  ;;  %v4241_v63 = vpop.f32.mrb[9].mxu1  ;;  %v430_v17 = vsel %vm24_vm0, %v410_v9, 0.0  ;;  %v413_v9 = vmul.f32 %v3890_v28, %v3890_v28 }
 0x1ef   :  { %4987 = vst [vmem:[#allocation44_spill] sm:$0xff] %v4241_v63 }
 0x1f1   :  { %v4249_v35 = vpop.f32.mrb[10].mxu1 }
 0x1f2   :  { %4988 = vst [vmem:[#allocation45_spill] sm:$0xff] %v4249_v35  ;;  %v4251_v48 = vpop.f32.mrb[11].mxu1 }
 0x1f3   :  { %4989 = vst [vmem:[#allocation46_spill] sm:$0xff] %v4251_v48 }
 0x1f5   :  { %428 = vadd.xlane.f32.xlu1 %v427_v29  ;;  %425 = vadd.xlane.f32.xlu0 %v424_v44  ;;  %v4259_v46 = vpop.f32.mrb[12].mxu1  ;;  %v433_v44 = vsel %vm24_vm0, %v411_v36, 0.0 }
 0x1f6   :  { %4990 = vst [vmem:[#allocation47_spill] sm:$0xff] %v4259_v46  ;;  %v4261_v63 = vpop.f32.mrb[13].mxu1 }
 0x1f7   :  { %4991 = vst [vmem:[#allocation48_spill] sm:$0xff] %v4261_v63 }
 0x1f9   :  { %437 = vadd.xlane.f32.xlu1 %v436_v59  ;;  %431 = vadd.xlane.f32.xlu0 %v430_v17  ;;  %v4269_v1 = vpop.f32.mrb[14].mxu1  ;;  %v439_v17 = vsel %vm24_vm0, %v413_v9, 0.0  ;;  %v418_v59 = vmul.f32 %v3929_v23, %v3929_v23 }
 0x1fa   :  { %4992 = vst [vmem:[#allocation49_spill] sm:$0xff] %v4269_v1  ;;  %v4271_v29 = vpop.f32.mrb[15].mxu1 }
 0x1fb   :  { %4993 = vst [vmem:[#allocation50_spill] sm:$0xff] %v4271_v29  ;;  %v454_v28 = vsel %vm24_vm0, %v418_v59, 0.0  ;;  %v419_v59 = vmul.f32 %v3935_v4, %v3935_v4 }
 0x1fd   :  { %443 = vadd.xlane.f32.xlu1 %v442_v43  ;;  %434 = vadd.xlane.f32.xlu0 %v433_v44  ;;  %v4279_v25 = vpop.f32.mrb[16].mxu1  ;;  %v445_v43 = vsel %vm24_vm0, %v415_v39, 0.0  ;;  %v420_v44 = vmul.f32 %v3941_v26, %v3941_v26 }
 0x1fe   :  { %4994 = vst [vmem:[#allocation51_spill] sm:$0xff] %v4279_v25  ;;  %v4281_v36 = vpop.f32.mrb[17].mxu1  ;;  %v5014_v25 = vld [vmem:[#allocation17_spill] sm:$0xff] }
 0x1ff   :  { %4995 = vst [vmem:[#allocation52_spill] sm:$0xff] %v4281_v36  ;;  %v460_v9 = vsel %vm24_vm0, %v420_v44, 0.0 }
 0x201   :  { %449 = vadd.xlane.f32.xlu1 %v448_v58  ;;  %440 = vadd.xlane.f32.xlu0 %v439_v17  ;;  %v4289_v23 = vpop.f32.mrb[18].mxu1  ;;  %v451_v58 = vsel %vm24_vm0, %v417_v0, 0.0  ;;  %v422_v17 = vmul.f32 %v3955_v2, %v3955_v2  ;;  %v4311_v2 = vpop.permute.xlu1 %2209 }
 0x202   :  { %4996 = vst [vmem:[#allocation53_spill] sm:$0xff] %v4289_v23  ;;  %v4291_v12 = vpop.f32.mrb[19].mxu1  ;;  %v4903_v23 = vmov 1.0  }
 0x203   :  { %4997 = vst [vmem:[#allocation54_spill] sm:$0xff] %v4291_v12  ;;  %v466_v50 = vsel %vm24_vm0, %v422_v17, 0.0 }
 0x205   :  { %455 = vadd.xlane.f32.xlu1 %v454_v28  ;;  %446 = vadd.xlane.f32.xlu0 %v445_v43  ;;  %v4299_v26 = vpop.f32.mrb[20].mxu1  ;;  %v457_v28 = vsel %vm24_vm0, %v419_v59, 0.0  ;;  %v421_v43 = vmul.f32 %v3949_v31, %v3949_v31 }
 0x206   :  { %4998 = vst [vmem:[#allocation55_spill] sm:$0xff] %v4299_v26  ;;  %v4301_v39 = vpop.f32.mrb[21].mxu1 }
 0x207   :  { %4999 = vst [vmem:[#allocation56_spill] sm:$0xff] %v4301_v39  ;;  %v463_v4 = vsel %vm24_vm0, %v421_v43, 0.0 }
 0x209   :  { %461 = vadd.xlane.f32.xlu1 %v460_v9  ;;  %452 = vadd.xlane.f32.xlu0 %v451_v58  ;;  %v4307_v44 = vpop.f32.mrb[22].mxu1  ;;  %v423_v9 = vmul.f32 %v3959_v22, %v3959_v22 }
 0x20a   :  { %5000 = vst [vmem:[#allocation57_spill] sm:$0xff] %v4307_v44  ;;  %v4309_v0 = vpop.f32.mrb[23].mxu1 }
 0x20b   :  { %5001 = vst [vmem:[#allocation58_spill] sm:$0xff] %v4309_v0  ;;  %v469_v31 = vsel %vm24_vm0, %v423_v9, 0.0 }
 0x20d   :  { %467 = vadd.xlane.f32.xlu1 %v466_v50  ;;  %458 = vadd.xlane.f32.xlu0 %v457_v28  ;;  %v4316_v58 = vpop.f32.mrb[24].mxu1 }
 0x20e   :  { %5002 = vst [vmem:[#allocation59_spill] sm:$0xff] %v4316_v58  ;;  %v4318_v17 = vpop.f32.mrb[25].mxu1 }
 0x20f   :  { %5003 = vst [vmem:[#allocation60_spill] sm:$0xff] %v4318_v17 }
 0x210   :  { %v1897_v59 = vpop.xlane.xlu0 %1896 }
 0x211   :  { %v1894_v29 = vpop.xlane.xlu1 %1893  ;;  %464 = vadd.xlane.f32.xlu0 %v463_v4  ;;  %v4321_v1 = vpop.f32.mrb[26].mxu1  ;;  %2848 = vrcp.f32 %v1897_v59 }
 0x212   :  { %5004 = vst [vmem:[#allocation61_spill] sm:$0xff] %v4321_v1  ;;  %v4323_v63 = vpop.f32.mrb[27].mxu1  ;;  %2850 = vrcp.f32 %v1894_v29 }
 0x213   :  { %5005 = vst [vmem:[#allocation62_spill] sm:$0xff] %v4323_v63 }
 0x214   :  { %v1903_v50 = vpop.xlane.xlu0 %1902 }
 0x215   :  { %v1900_v28 = vpop.xlane.xlu1 %1899  ;;  %470 = vadd.xlane.f32.xlu0 %v469_v31  ;;  %v4325_v43 = vpop.f32.mrb[28].mxu1  ;;  %2852 = vrcp.f32 %v1903_v50 }
 0x216   :  { %5006 = vst [vmem:[#allocation63_spill] sm:$0xff] %v4325_v43  ;;  %v4327_v46 = vpop.f32.mrb[29].mxu1  ;;  %2854 = vrcp.f32 %v1900_v28 }
 0x217   :  { %5007 = vst [vmem:[#allocation64_spill] sm:$0xff] %v4327_v46 }
 0x218   :  { %v1909_v22 = vpop.xlane.xlu0 %1908 }
 0x219   :  { %v1906_v35 = vpop.xlane.xlu1 %1905  ;;  %v4329_v48 = vpop.f32.mrb[30].mxu1  ;;  %2856 = vrcp.f32 %v1909_v22 }
 0x21a   :  { %5008 = vst [vmem:[#allocation65_spill] sm:$0xff] %v4329_v48  ;;  %v4331_v47 = vpop.f32.mrb[31].mxu1  ;;  %v4344_v48 = vld [vmem:[%s4859_s3] sm:$0x3] }
 0x21b   :  { %5009 = vst [vmem:[#allocation66_spill] sm:$0xff] %v4331_v47  ;;  %v5010_v47 = vld [vmem:[#allocation5_spill] sm:$0xff]  ;;  %v2849_v50 = vpop.eup %2848 }
 0x21c   :  { %v1915_v4 = vpop.xlane.xlu0 %1914  ;;  %v4904_v46 = vcvt.s32.f32 %v5010_v47  ;;  %v2255_v44 = vsub.s32 1, %v5010_v47  ;;  %v2851_v28 = vpop.eup %2850 }
 0x21d   :  { %v1912_v53 = vpop.xlane.xlu1 %1911 }
 0x21e   :  { %v2256_v17 = vrot.slane %v4344_v48, %v2255_v44 }
 0x21f   :  { %v2853_v44 = vpop.eup %2852 }
 0x220   :  { %v1921_v9 = vpop.xlane.xlu0 %1920  ;;  %vm2260_vm2 = vcmp.eq.f32.partialorder %v2256_v17, %v4904_v46  ;;  %v2855_v39 = vpop.eup %2854 }
 0x221   :  { %v1918_v30 = vpop.xlane.xlu1 %1917  ;;  %2530 = vmatprep.mubr.msk.f32.mxu1 %vm2260_vm2, %v4903_v23 }
 0x223   :  { %v2857_v17 = vpop.eup %2856 }
 0x224   :  { %v1927_v27 = vpop.xlane.xlu0 %1926 }
 0x225   :  { %v1924_v1 = vpop.xlane.xlu1 %1923 }
 0x229   :  { %v4333_v58 = vpop.xlane.xlu1 %1932  ;;  %v4335_v63 = vpop.xlane.xlu0 %1929 }
 0x22d   :  { %v4337_v31 = vpop.xlane.xlu1 %1938  ;;  %v4339_v43 = vpop.xlane.xlu0 %1935 }
 0x231   :  { %v1942_v59 = vpop.xlane.xlu1 %1941  ;;  %v1945_v26 = vpop.xlane.xlu0 %1944 }
 0x232   :  { %2858 = vrcp.f32 %v1942_v59 }
 0x233   :  { %2860 = vrcp.f32 %v1945_v26  ;;  %v2020_v26 = vmul.f32 %v2851_v28, %v4043_v15  ;;  %v5011_v15 = vld [vmem:[#allocation8_spill] sm:$0xff] }
 0x234   :  { %2862 = vrcp.f32 %v1906_v35  ;;  %v2021_v35 = vmul.f32 %v2849_v50, %v4041_v16  ;;  %v5012_v16 = vld [vmem:[#allocation11_spill] sm:$0xff] }
 0x235   :  { %2864 = vrcp.f32 %v1915_v4  ;;  %v1948_v29 = vpop.xlane.xlu1 %1947  ;;  %v1951_v0 = vpop.xlane.xlu0 %1950  ;;  %v2212_v50 = vmul.f32 %v5012_v16, %v2020_v26 }
 0x236   :  { %2866 = vrcp.f32 %v1948_v29  ;;  %v2023_v29 = vmul.f32 %v2853_v44, %v4053_v38 }
 0x237   :  { %2868 = vrcp.f32 %v1951_v0 }
 0x238   :  { %2870 = vrcp.f32 %v1912_v53 }
 0x239   :  { %2872 = vrcp.f32 %v1921_v9  ;;  %v1954_v22 = vpop.xlane.xlu1 %1953  ;;  %v1957_v59 = vpop.xlane.xlu0 %1956  ;;  %v2022_v9 = vmul.f32 %v2855_v39, %v4055_v56 }
 0x23a   :  { %2874 = vrcp.f32 %v1954_v22 }
 0x23b   :  { %2876 = vrcp.f32 %v1957_v59 }
 0x23c   :  { %v2859_v4 = vpop.eup %2858  ;;  %2878 = vrcp.f32 %v1918_v30  ;;  %v5013_v30 = vld [vmem:[#allocation14_spill] sm:$0xff] }
 0x23d   :  { %v2861_v23 = vpop.eup %2860  ;;  %v1960_v0 = vpop.xlane.xlu1 %1959  ;;  %v2036_v53 = vmul.f32 %v2859_v4, %v4139_v7  ;;  %v2213_v36 = vmul.f32 %v5013_v30, %v2021_v35  ;;  %v2215_v7 = vmul.f32 %v5014_v25, %v2023_v29 }
 0x23e   :  { %v1963_v46 = vpop.xlane.xlu0 %1962  ;;  %v2863_v12 = vpop.eup %2862  ;;  %2880 = vrcp.f32 %v1960_v0  ;;  %v2037_v22 = vmul.f32 %v2861_v23, %v4137_v11  ;;  %v5015_v23 = vld [vmem:[#allocation15_spill] sm:$0xff]  ;;  %v2025_v0 = vmul.f32 %v2857_v17, %v4065_v3 }
 0x23f   :  { %v2865_v59 = vpop.eup %2864  ;;  %2882 = vrcp.f32 %v1963_v46  ;;  %v2228_v28 = vmul.f32 %v5011_v15, %v2036_v53  ;;  %v2214_v46 = vmul.f32 %v5015_v23, %v2022_v9  ;;  %v2738_v25 = vpack.c.bf16 %v2213_v36, %v2212_v50 }
 0x240   :  { %v2867_v38 = vpop.eup %2866  ;;  %2884 = vrcp.f32 %v1927_v27  ;;  %v2229_v44 = vmul.f32 %v3904_v5, %v2037_v22  ;;  %v2024_v27 = vmul.f32 %v2863_v12, %v4067_v41  ;;  %v5016_v12 = vld [vmem:[#allocation19_spill] sm:$0xff]  ;;  %v2027_v50 = vmul.f32 %v2865_v59, %v4077_v33 }
 0x241   :  { %v2869_v4 = vpop.eup %2868  ;;  %2886 = vrcp.f32 %v1924_v1  ;;  %v1966_v56 = vpop.xlane.xlu1 %1965  ;;  %v2038_v11 = vmul.f32 %v2867_v38, %v4151_v57  ;;  %v2217_v22 = vmul.f32 %v5016_v12, %v2025_v0  ;;  %v5019_v38 = vld [vmem:[#allocation25_spill] sm:$0xff] }
 0x242   :  { %v1969_v39 = vpop.xlane.xlu0 %1968  ;;  %v2871_v53 = vpop.eup %2870  ;;  %2888 = vrcp.f32 %v1966_v56  ;;  %v2736_v26 = vpack.c.bf16 %v2229_v44, %v2228_v28  ;;  %v2039_v35 = vmul.f32 %v2869_v4, %v4149_v34  ;;  %v2742_v34 = vpack.c.bf16 %v2215_v7, %v2214_v46  ;;  %v5020_v46 = vld [vmem:[#allocation20_spill] sm:$0xff] }
 0x243   :  { %v2873_v5 = vpop.eup %2872  ;;  %2890 = vrcp.f32 %v1969_v39  ;;  %v2230_v1 = vmul.f32 %v3927_v60, %v2038_v11 }
 0x244   :  { %v2875_v29 = vpop.eup %2874  ;;  %2892 = vrcp.f32 %v4333_v58  ;;  %2737 = vmatprep.subr.bf16.mxu1 %v2736_v26  ;;  %v2231_v57 = vmul.f32 %v3945_v37, %v2039_v35  ;;  %v5017_v58 = vld [vmem:[#allocation18_spill] sm:$0xff]  ;;  %v5018_v37 = vld [vmem:[#allocation23_spill] sm:$0xff]  ;;  %v2029_v39 = vmul.f32 %v2873_v5, %v4089_v18 }
 0x245   :  { %v2877_v9 = vpop.eup %2876  ;;  %2894 = vrcp.f32 %v4335_v63  ;;  %2739 = vmatpush3.bf16.msra.mxu1 %v2738_v25  ;;  %v1972_v3 = vpop.xlane.xlu1 %1971  ;;  %v2040_v41 = vmul.f32 %v2875_v29, %v4163_v54  ;;  %v2216_v28 = vmul.f32 %v5017_v58, %v2024_v27  ;;  %v2026_v63 = vmul.f32 %v2871_v53, %v4079_v61  ;;  %v5021_v53 = vld [vmem:[#allocation27_spill] sm:$0xff]  ;;  %v5022_v35 = vld [vmem:[#allocation22_spill] sm:$0xff]  ;;  %v5024_v29 = vld [vmem:[#allocation28_spill] sm:$0xff] }
 0x246   :  { %v1975_v17 = vpop.xlane.xlu0 %1974  ;;  %v2879_v36 = vpop.eup %2878  ;;  %2896 = vrcp.f32 %v1972_v3  ;;  %v2740_v60 = vpack.c.bf16 %v2231_v57, %v2230_v1  ;;  %v2041_v15 = vmul.f32 %v2877_v9, %v4161_v45  ;;  %v2219_v27 = vmul.f32 %v5022_v35, %v2027_v50  ;;  %v5025_v9 = vld [vmem:[#allocation30_spill] sm:$0xff] }
 0x247   :  { %2898 = vrcp.f32 %v1975_v17  ;;  %v2232_v16 = vmul.f32 %v5018_v37, %v2040_v41  ;;  %v2028_v45 = vmul.f32 %v2879_v36, %v4091_v40  ;;  %v2746_v61 = vpack.c.bf16 %v2217_v22, %v2216_v28  ;;  %v5023_v40 = vld [vmem:[#allocation21_spill] sm:$0xff] }
 0x248   :  { %v2881_v30 = vpop.eup %2880  ;;  %2741 = vmatprep.subr.bf16.mxu1 %v2740_v60  ;;  %v2233_v54 = vmul.f32 %v5019_v38, %v2041_v15  ;;  %v2218_v26 = vmul.f32 %v5021_v53, %v2026_v63  ;;  %v2221_v3 = vmul.f32 %v5025_v9, %v2029_v39  ;;  %v5034_v53 = vld [vmem:[#allocation39_spill] sm:$0xff]  ;;  %v5036_v9 = vld [vmem:[#allocation38_spill] sm:$0xff] }
 0x249   :  { %v2883_v44 = vpop.eup %2882  ;;  %2743 = vmatpush3.bf16.msra.mxu1 %v2742_v34  ;;  %v1978_v7 = vpop.xlane.xlu1 %1977  ;;  %v2042_v56 = vmul.f32 %v2881_v30, %v4175_v13  ;;  %v2220_v57 = vmul.f32 %v5024_v29, %v2028_v45  ;;  %v5029_v30 = vld [vmem:[#allocation29_spill] sm:$0xff] }
 0x24a   :  { %v1981_v4 = vpop.xlane.xlu0 %1980  ;;  %v2885_v11 = vpop.eup %2884  ;;  %2900 = vrcp.f32 %v1978_v7  ;;  %v2744_v23 = vpack.c.bf16 %v2233_v54, %v2232_v16  ;;  %v2043_v33 = vmul.f32 %v2883_v44, %v4173_v6  ;;  %v2750_v22 = vpack.c.bf16 %v2219_v27, %v2218_v26  ;;  %v5030_v54 = vld [vmem:[#allocation32_spill] sm:$0xff]  ;;  %v5035_v27 = vld [vmem:[#allocation37_spill] sm:$0xff] }
 0x24b   :  { %v2887_v59 = vpop.eup %2886  ;;  %2902 = vrcp.f32 %v1981_v4  ;;  %v2234_v0 = vmul.f32 %v5020_v46, %v2042_v56  ;;  %v2031_v41 = vmul.f32 %v2885_v11, %v4101_v42  ;;  %v2754_v63 = vpack.c.bf16 %v2221_v3, %v2220_v57  ;;  %v5028_v42 = vld [vmem:[#allocation35_spill] sm:$0xff]  ;;  %v5031_v56 = vld [vmem:[#allocation33_spill] sm:$0xff] }
 0x24c   :  { %v2889_v25 = vpop.eup %2888  ;;  %2904 = vrcp.f32 %v4339_v43  ;;  %2745 = vmatprep.subr.bf16.mxu1 %v2744_v23  ;;  %v2235_v18 = vmul.f32 %v5023_v40, %v2043_v33  ;;  %v2030_v60 = vmul.f32 %v2887_v59, %v4103_v55  ;;  %v5032_v59 = vld [vmem:[#allocation34_spill] sm:$0xff] }
 0x24d   :  { %v2891_v13 = vpop.eup %2890  ;;  %2906 = vrcp.f32 %v4337_v31  ;;  %2747 = vmatpush3.bf16.msra.mxu1 %v2746_v61  ;;  %v1984_v5 = vpop.xlane.xlu1 %1983  ;;  %v2044_v1 = vmul.f32 %v2889_v25, %v4187_v19  ;;  %v5026_v31 = vld [vmem:[#allocation24_spill] sm:$0xff]  ;;  %v5027_v19 = vld [vmem:[#allocation26_spill] sm:$0xff]  ;;  %v2223_v50 = vmul.f32 %v5028_v42, %v2031_v41  ;;  %v5037_v41 = vcvt.s32.f32 %v5010_v47 }
 0x24e   :  { %v1987_v6 = vpop.xlane.xlu0 %1986  ;;  %v2893_v17 = vpop.eup %2892  ;;  %2908 = vrcp.f32 %v1984_v5  ;;  %v2748_v34 = vpack.c.bf16 %v2235_v18, %v2234_v0  ;;  %v2045_v43 = vmul.f32 %v2891_v13, %v4185_v20  ;;  %v2222_v44 = vmul.f32 %v5030_v54, %v2030_v60  ;;  %v5033_v0 = vld [vmem:[#allocation36_spill] sm:$0xff]  ;;  %v5044_v54 = vld [vmem:[#allocation58_spill] sm:$0xff] }
 0x24f   :  { %v2895_v12 = vpop.eup %2894  ;;  %2910 = vrcp.f32 %v1987_v6  ;;  %v2236_v36 = vmul.f32 %v5026_v31, %v2044_v1  ;;  %v2033_v7 = vmul.f32 %v2893_v17, %v4113_v21 }
 0x250   :  { %v2897_v15 = vpop.eup %2896  ;;  %2749 = vmatprep.subr.bf16.mxu1 %v2748_v34  ;;  %v2237_v58 = vmul.f32 %v5027_v19, %v2045_v43  ;;  %v2032_v55 = vmul.f32 %v2895_v12, %v4115_v14  ;;  %v2758_v33 = vpack.c.bf16 %v2223_v50, %v2222_v44  ;;  %v702_v44 = vmul.f32 2.0, %v5044_v54 }
 0x251   :  { %v2899_v28 = vpop.eup %2898  ;;  %2751 = vmatpush3.bf16.msra.mxu1 %v2750_v22  ;;  %v2046_v37 = vmul.f32 %v2897_v15, %v4195_v8  ;;  %v2225_v21 = vmul.f32 %v5034_v53, %v2033_v7  ;;  %v2130_v13 = vpop.permute.xlu1 %2129  ;;  %v5040_v22 = vld [vmem:[#allocation52_spill] sm:$0xff] }
 0x252   :  { %v2752_v16 = vpack.c.bf16 %v2237_v58, %v2236_v36  ;;  %v2047_v20 = vmul.f32 %v2899_v28, %v4193_v62  ;;  %v2224_v14 = vmul.f32 %v5033_v0, %v2032_v55  ;;  %v696_v31 = vmul.f32 2.0, %v5040_v22  ;;  %v5042_v28 = vld [vmem:[#allocation54_spill] sm:$0xff] }
 0x253   :  { %v2238_v38 = vmul.f32 %v5029_v30, %v2046_v37  ;;  %v698_v37 = vmul.f32 2.0, %v5042_v28 }
 0x254   :  { %v2901_v4 = vpop.eup %2900  ;;  %2753 = vmatprep.subr.bf16.mxu1 %v2752_v16  ;;  %v2239_v45 = vmul.f32 %v5031_v56, %v2047_v20  ;;  %v2762_v57 = vpack.c.bf16 %v2225_v21, %v2224_v14  ;;  %v5043_v16 = vld [vmem:[#allocation56_spill] sm:$0xff] }
 0x255   :  { %v2903_v39 = vpop.eup %2902  ;;  %2755 = vmatpush3.bf16.msra.mxu1 %v2754_v63  ;;  %v2048_v8 = vmul.f32 %v2901_v4, %v4203_v52  ;;  %v2125_v35 = vpop.permute.xlu0 %2124  ;;  %v700_v63 = vmul.f32 2.0, %v5043_v16 }
 0x256   :  { %v2905_v11 = vpop.eup %2904  ;;  %v2756_v62 = vpack.c.bf16 %v2239_v45, %v2238_v38  ;;  %v2049_v23 = vmul.f32 %v2903_v39, %v4201_v32  ;;  %v2251_v32 = vsub.s32 0, %v5010_v47 }
 0x257   :  { %v2907_v61 = vpop.eup %2906  ;;  %v2240_v46 = vmul.f32 %v5032_v59, %v2048_v8  ;;  %v2034_v52 = vmul.f32 %v2905_v11, %v4127_v51  ;;  %v5045_v8 = vld [vmem:[#allocation53_spill] sm:$0xff] }
 0x258   :  { %v2909_v26 = vpop.eup %2908  ;;  %2757 = vmatprep.subr.bf16.mxu1 %v2756_v62  ;;  %v2241_v25 = vmul.f32 %v5035_v27, %v2049_v23  ;;  %v2035_v1 = vmul.f32 %v2907_v61, %v4125_v24  ;;  %v2252_v51 = vrot.slane %v4344_v48, %v2251_v32  ;;  %v5039_v24 = vld [vmem:[#allocation51_spill] sm:$0xff]  ;;  %v699_v11 = vmul.f32 2.0, %v5045_v8 }
 0x259   :  { %v2911_v40 = vpop.eup %2910  ;;  %2759 = vmatpush3.bf16.msra.mxu1 %v2758_v33  ;;  %v2050_v18 = vmul.f32 %v2909_v26, %v4211_v49  ;;  %v2226_v29 = vmul.f32 %v2125_v35, %v2034_v52  ;;  %v697_v12 = vmul.f32 2.0, %v5039_v24  ;;  %v5046_v33 = vld [vmem:[#allocation55_spill] sm:$0xff]  ;;  %v5047_v35 = vld [vmem:[#allocation60_spill] sm:$0xff] }
 0x25a   :  { %v2760_v5 = vpack.c.bf16 %v2241_v25, %v2240_v46  ;;  %v2051_v6 = vmul.f32 %v2911_v40, %v4209_v10  ;;  %v2227_v34 = vmul.f32 %v2130_v13, %v2035_v1  ;;  %vm2259_vm3 = vcmp.eq.f32.partialorder %v2252_v51, %v5037_v41 }
 0x25b   :  { %v2242_v3 = vmul.f32 %v5036_v9, %v2050_v18  ;;  %v5038_v10 = vmov 1.0   ;;  %v701_v59 = vmul.f32 2.0, %v5046_v33  ;;  %v704_v27 = vmul.f32 2.0, %v5047_v35 }
 0x25c   :  { %2761 = vmatprep.subr.bf16.mxu1 %v2760_v5  ;;  %v2243_v17 = vmul.f32 %v4311_v2, %v2051_v6  ;;  %v2766_v43 = vpack.c.bf16 %v2227_v34, %v2226_v29  ;;  %v5041_v2 = vld [vmem:[#allocation7_spill] sm:$0xff]  ;;  %v5048_v5 = vld [vmem:[#allocation57_spill] sm:$0xff] }
 0x25d   :  { %2763 = vmatpush3.bf16.msra.mxu1 %v2762_v57  ;;  %v703_v6 = vmul.f32 2.0, %v5048_v5 }
 0x25e   :  { %v2764_v49 = vpack.c.bf16 %v2243_v17, %v2242_v3  ;;  %v5049_v17 = vld [vmem:[#allocation62_spill] sm:$0xff] }
 0x25f   :  { %v706_v34 = vmul.f32 2.0, %v5049_v17 }
 0x260   :  { %2765 = vmatprep.subr.bf16.mxu1 %v2764_v49 }
 0x261   :  { %2767 = vmatpush3.bf16.msra.mxu1 %v2766_v43  ;;  %v5050_v43 = vld [vmem:[#allocation59_spill] sm:$0xff] }
 0x262   :  { %v705_v41 = vmul.f32 2.0, %v5050_v43 }
 0x264   :  { %2531 = vmatmul.mubr.msk.f32.vlgmr.msra.gmra.mrb[32].mxu1 %vm2259_vm3, %v5038_v10 }
 0x282   :  { %v429_v36 = vpop.xlane.xlu1 %428  ;;  %v426_v60 = vpop.xlane.xlu0 %425 }
 0x283   :  { %v681_v15 = vadd.f32 %v5041_v2, %v429_v36  ;;  %v680_v19 = vadd.f32 %v5041_v2, %v426_v60 }
 0x285   :  { %v713_v48 = vsub.f32 %v681_v15, %v697_v12  ;;  %v712_v58 = vsub.f32 %v680_v19, %v696_v31 }
 0x286   :  { %v438_v47 = vpop.xlane.xlu1 %437  ;;  %v432_v20 = vpop.xlane.xlu0 %431 }
 0x287   :  { %v4429_v42 = vmax.f32 %v713_v48, 0.0  ;;  %v4431_v50 = vmax.f32 %v712_v58, 0.0  ;;  %v684_v30 = vadd.f32 %v5041_v2, %v438_v47  ;;  %v682_v38 = vadd.f32 %v5041_v2, %v432_v20  ;;  %v5051_v58 = vld [vmem:[#allocation64_spill] sm:$0xff] }
 0x288   :  { %v708_v28 = vmul.f32 2.0, %v5051_v58 }
 0x289   :  { %v745_v55 = vsub.f32 0.0, %v4429_v42  ;;  %v744_v7 = vsub.f32 0.0, %v4431_v50  ;;  %v716_v4 = vsub.f32 %v684_v30, %v700_v63  ;;  %v714_v56 = vsub.f32 %v682_v38, %v698_v37  ;;  %v5052_v63 = vld [vmem:[#allocation61_spill] sm:$0xff] }
 0x28a   :  { %v444_v45 = vpop.xlane.xlu1 %443  ;;  %v435_v39 = vpop.xlane.xlu0 %434  ;;  %v707_v47 = vmul.f32 2.0, %v5052_v63 }
 0x28b   :  { %v4439_v62 = vmax.f32 %v714_v56, 0.0  ;;  %v686_v23 = vadd.f32 %v5041_v2, %v444_v45  ;;  %v683_v61 = vadd.f32 %v5041_v2, %v435_v39  ;;  %v4444_v46 = vmax.f32 %v716_v4, 0.0 }
 0x28c   :  { %v763_v0 = vsel %vm24_vm0, %v745_v55, -inf  ;;  %v760_v14 = vsel %vm24_vm0, %v744_v7, -inf }
 0x28d   :  { %v746_v53 = vsub.f32 0.0, %v4439_v62  ;;  %v718_v21 = vsub.f32 %v686_v23, %v702_v44  ;;  %v715_v26 = vsub.f32 %v683_v61, %v699_v11  ;;  %764 = vmax.xlane.f32.xlu0 %v763_v0  ;;  %761 = vmax.xlane.f32.xlu1 %v760_v14  ;;  %v748_v13 = vsub.f32 0.0, %v4444_v46  ;;  %v5053_v11 = vld [vmem:[#allocation66_spill] sm:$0xff] }
 0x28e   :  { %v450_v25 = vpop.xlane.xlu1 %449  ;;  %v441_v40 = vpop.xlane.xlu0 %440  ;;  %v710_v23 = vmul.f32 2.0, %v5053_v11 }
 0x28f   :  { %v4454_v52 = vmax.f32 %v715_v26, 0.0  ;;  %v688_v18 = vadd.f32 %v5041_v2, %v450_v25  ;;  %v685_v32 = vadd.f32 %v5041_v2, %v441_v40  ;;  %v4460_v1 = vmax.f32 %v718_v21, 0.0  ;;  %v5054_v25 = vld [vmem:[#allocation63_spill] sm:$0xff] }
 0x290   :  { %v766_v29 = vsel %vm24_vm0, %v746_v53, -inf  ;;  %v772_v36 = vsel %vm24_vm0, %v748_v13, -inf  ;;  %v709_v40 = vmul.f32 2.0, %v5054_v25 }
 0x291   :  { %v747_v57 = vsub.f32 0.0, %v4454_v52  ;;  %v720_v9 = vsub.f32 %v688_v18, %v704_v27  ;;  %v717_v3 = vsub.f32 %v685_v32, %v701_v59  ;;  %767 = vmax.xlane.f32.xlu1 %v766_v29  ;;  %v750_v22 = vsub.f32 0.0, %v4460_v1 }
 0x292   :  { %v456_v51 = vpop.xlane.xlu1 %455  ;;  %v447_v49 = vpop.xlane.xlu0 %446 }
 0x293   :  { %v4468_v10 = vmax.f32 %v717_v3, 0.0  ;;  %v690_v24 = vadd.f32 %v5041_v2, %v456_v51  ;;  %v687_v12 = vadd.f32 %v5041_v2, %v447_v49  ;;  %v4473_v31 = vmax.f32 %v720_v9, 0.0  ;;  %v5055_v49 = vld [vmem:[#allocation65_spill] sm:$0xff] }
 0x294   :  { %v769_v60 = vsel %vm24_vm0, %v747_v57, -inf  ;;  %v778_v4 = vsel %vm24_vm0, %v750_v22, -inf  ;;  %v711_v43 = vmul.f32 2.0, %v5055_v49 }
 0x295   :  { %v749_v15 = vsub.f32 0.0, %v4468_v10  ;;  %v722_v19 = vsub.f32 %v690_v24, %v706_v34  ;;  %v719_v48 = vsub.f32 %v687_v12, %v703_v6  ;;  %773 = vmax.xlane.f32.xlu1 %v772_v36  ;;  %770 = vmax.xlane.f32.xlu0 %v769_v60  ;;  %v752_v54 = vsub.f32 0.0, %v4473_v31  ;;  %v2980_v31 = vld [vmem:[%s4856_s0 + $0x8] sm:$0xff] }
 0x296   :  { %v462_v37 = vpop.xlane.xlu1 %461  ;;  %v453_v16 = vpop.xlane.xlu0 %452 }
 0x297   :  { %v4484_v20 = vmax.f32 %v719_v48, 0.0  ;;  %v692_v30 = vadd.f32 %v5041_v2, %v462_v37  ;;  %v689_v38 = vadd.f32 %v5041_v2, %v453_v16  ;;  %v4489_v44 = vmax.f32 %v722_v19, 0.0 }
 0x298   :  { %v775_v56 = vsel %vm24_vm0, %v749_v15, -inf  ;;  %v784_v35 = vsel %vm24_vm0, %v752_v54, -inf }
 0x299   :  { %v751_v45 = vsub.f32 0.0, %v4484_v20  ;;  %v724_v39 = vsub.f32 %v692_v30, %v708_v28  ;;  %v721_v8 = vsub.f32 %v689_v38, %v705_v41  ;;  %779 = vmax.xlane.f32.xlu1 %v778_v4  ;;  %776 = vmax.xlane.f32.xlu0 %v775_v56  ;;  %v754_v21 = vsub.f32 0.0, %v4489_v44  ;;  %v2982_v44 = vld [vmem:[%s4856_s0 + $0x18] sm:$0xff] }
 0x29a   :  { %v468_v61 = vpop.xlane.xlu1 %467  ;;  %v459_v33 = vpop.xlane.xlu0 %458 }
 0x29b   :  { %v4499_v59 = vmax.f32 %v721_v8, 0.0  ;;  %v694_v0 = vadd.f32 %v5041_v2, %v468_v61  ;;  %v691_v14 = vadd.f32 %v5041_v2, %v459_v33  ;;  %v4504_v26 = vmax.f32 %v724_v39, 0.0 }
 0x29c   :  { %v781_v27 = vsel %vm24_vm0, %v751_v45, -inf  ;;  %v790_v51 = vsel %vm24_vm0, %v754_v21, -inf }
 0x29d   :  { %v753_v18 = vsub.f32 0.0, %v4499_v59  ;;  %v726_v32 = vsub.f32 %v694_v0, %v710_v23  ;;  %v723_v5 = vsub.f32 %v691_v14, %v707_v47  ;;  %785 = vmax.xlane.f32.xlu1 %v784_v35  ;;  %782 = vmax.xlane.f32.xlu0 %v781_v27  ;;  %v756_v17 = vsub.f32 0.0, %v4504_v26  ;;  %v2984_v26 = vld [vmem:[%s4856_s0 + $0x28] sm:$0xff] }
 0x29e   :  { %v465_v6 = vpop.xlane.xlu0 %464 }
 0x29f   :  { %v4514_v29 = vmax.f32 %v723_v5, 0.0  ;;  %v693_v9 = vadd.f32 %v5041_v2, %v465_v6  ;;  %v787_v3 = vsel %vm24_vm0, %v753_v18, -inf  ;;  %v4521_v34 = vmax.f32 %v726_v32, 0.0 }
 0x2a0   :  { %v796_v58 = vsel %vm24_vm0, %v756_v17, -inf }
 0x2a1   :  { %v755_v41 = vsub.f32 0.0, %v4514_v29  ;;  %v725_v24 = vsub.f32 %v693_v9, %v709_v40  ;;  %791 = vmax.xlane.f32.xlu1 %v790_v51  ;;  %788 = vmax.xlane.f32.xlu0 %v787_v3  ;;  %v758_v48 = vsub.f32 0.0, %v4521_v34  ;;  %v2979_v3 = vld [vmem:[%s4856_s0] sm:$0xff]  ;;  %v2986_v34 = vld [vmem:[%s4856_s0 + $0x38] sm:$0xff] }
 0x2a2   :  { %v471_v12 = vpop.xlane.xlu0 %470  ;;  %v48_v51 = vmul.f32 %v2979_v3, %v2979_v3 }
 0x2a3   :  { %v4528_v36 = vmax.f32 %v725_v24, 0.0  ;;  %v695_v60 = vadd.f32 %v5041_v2, %v471_v12  ;;  %v793_v19 = vsel %vm24_vm0, %v755_v41, -inf  ;;  %v802_v63 = vsel %vm24_vm0, %v758_v48, -inf }
 0x2a5   :  { %v757_v28 = vsub.f32 0.0, %v4528_v36  ;;  %v727_v37 = vsub.f32 %v695_v60, %v711_v43  ;;  %797 = vmax.xlane.f32.xlu1 %v796_v58  ;;  %794 = vmax.xlane.f32.xlu0 %v793_v19  ;;  %v64_v60 = vsel %vm24_vm0, %v48_v51, 0.0 }
 0x2a7   :  { %v4539_v16 = vmax.f32 %v727_v37, 0.0  ;;  %v799_v2 = vsel %vm24_vm0, %v757_v28, -inf }
 0x2a9   :  { %v759_v47 = vsub.f32 0.0, %v4539_v16  ;;  %803 = vmax.xlane.f32.xlu1 %v802_v63  ;;  %800 = vmax.xlane.f32.xlu0 %v799_v2  ;;  %v2987_v16 = vld [vmem:[%s4856_s0 + $0x40] sm:$0xff] }
 0x2ab   :  { %v805_v30 = vsel %vm24_vm0, %v759_v47, -inf }
 0x2ad   :  { %806 = vmax.xlane.f32.xlu0 %v805_v30  ;;  %v2981_v30 = vld [vmem:[%s4856_s0 + $0x10] sm:$0xff] }
 0x31a   :  { %v762_v38 = vpop.xlane.xlu1 %761  ;;  %v765_v4 = vpop.xlane.xlu0 %764 }
 0x31b   :  { %v808_v56 = vsub.f32 %v744_v7, %v762_v38  ;;  %v809_v39 = vsub.f32 %v745_v55, %v765_v4  ;;  %v50_v38 = vmul.f32 %v2981_v30, %v2981_v30 }
 0x31d   :  { %v824_v8 = vmul.f32 1.442695, %v808_v56  ;;  %v826_v11 = vmul.f32 1.442695, %v809_v39 }
 0x31e   :  { %v768_v23 = vpop.xlane.xlu1 %767 }
 0x31f   :  { %2912 = vpow2.f32 %v824_v8  ;;  %v810_v61 = vsub.f32 %v746_v53, %v768_v23 }
 0x320   :  { %2914 = vpow2.f32 %v826_v11  ;;  %v70_v11 = vsel %vm24_vm0, %v50_v38, 0.0  ;;  %v2989_v38 = vld [vmem:[%s4856_s0 + $0x50] sm:$0xff] }
 0x321   :  { %v828_v33 = vmul.f32 1.442695, %v810_v61 }
 0x322   :  { %v774_v0 = vpop.xlane.xlu1 %773  ;;  %v771_v14 = vpop.xlane.xlu0 %770 }
 0x323   :  { %2916 = vpow2.f32 %v828_v33  ;;  %v812_v35 = vsub.f32 %v748_v13, %v774_v0  ;;  %v811_v50 = vsub.f32 %v747_v57, %v771_v14  ;;  %v2978_v57 = vld [vmem:[%s4858_s2] sm:$0xff] }
 0x324   :  { %v23_v10 = vmul.f32 %v2978_v57, %v2978_v57  ;;  %v2985_v57 = vld [vmem:[%s4856_s0 + $0x30] sm:$0xff] }
 0x325   :  { %v830_v42 = vmul.f32 1.442695, %v811_v50  ;;  %v832_v55 = vmul.f32 1.442695, %v812_v35  ;;  %v2983_v35 = vld [vmem:[%s4856_s0 + $0x20] sm:$0xff] }
 0x326   :  { %v780_v7 = vpop.xlane.xlu1 %779  ;;  %v777_v27 = vpop.xlane.xlu0 %776  ;;  %v25_v9 = vsel %vm24_vm0, %v23_v10, 0.0  ;;  %v52_v50 = vmul.f32 %v2983_v35, %v2983_v35  ;;  %v54_v10 = vmul.f32 %v2985_v57, %v2985_v57  ;;  %v2992_v35 = vld [vmem:[%s4860_s4 + $0x98] sm:$0xff] }
 0x327   :  { %v813_v25 = vsub.f32 %v749_v15, %v777_v27  ;;  %2918 = vpow2.f32 %v830_v42  ;;  %v814_v53 = vsub.f32 %v750_v22, %v780_v7 }
 0x328   :  { %2920 = vpow2.f32 %v832_v55 }
 0x329   :  { %v4563_v62 = vpop.eup %2912  ;;  %v834_v40 = vmul.f32 1.442695, %v813_v25  ;;  %v836_v22 = vmul.f32 1.442695, %v814_v53  ;;  %v76_v25 = vsel %vm24_vm0, %v52_v50, 0.0  ;;  %v2405_v50 = vsel %vm2367_vm1, %v2992_v35, 0.0 }
 0x32a   :  { %v4567_v32 = vpop.eup %2914  ;;  %v783_v46 = vpop.xlane.xlu0 %782  ;;  %v856_v52 = vsel %vm24_vm0, %v4563_v62, 0.0 }
 0x32b   :  { %857 = vadd.xlane.f32.xlu1 %v856_v52  ;;  %v859_v13 = vsel %vm24_vm0, %v4567_v32, 0.0  ;;  %2922 = vpow2.f32 %v834_v40  ;;  %v815_v15 = vsub.f32 %v751_v45, %v783_v46  ;;  %v786_v5 = vpop.xlane.xlu1 %785 }
 0x32c   :  { %860 = vadd.xlane.f32.xlu0 %v859_v13  ;;  %2924 = vpow2.f32 %v836_v22  ;;  %v816_v49 = vsub.f32 %v752_v54, %v786_v5  ;;  %v49_v54 = vmul.f32 %v2980_v31, %v2980_v31  ;;  %v2988_v31 = vld [vmem:[%s4856_s0 + $0x48] sm:$0xff] }
 0x32d   :  { %v4576_v1 = vpop.eup %2916  ;;  %v838_v43 = vmul.f32 1.442695, %v815_v15 }
 0x32e   :  { %v862_v6 = vsel %vm24_vm0, %v4576_v1, 0.0  ;;  %v789_v20 = vpop.xlane.xlu0 %788  ;;  %v840_v19 = vmul.f32 1.442695, %v816_v49  ;;  %v67_v4 = vsel %vm24_vm0, %v49_v54, 0.0  ;;  %v57_v54 = vmul.f32 %v2988_v31, %v2988_v31  ;;  %v3000_v31 = vld [vmem:[%s4860_s4 + $0xb8] sm:$0xff] }
 0x32f   :  { %863 = vadd.xlane.f32.xlu1 %v862_v6  ;;  %2926 = vpow2.f32 %v838_v43  ;;  %v817_v58 = vsub.f32 %v753_v18, %v789_v20  ;;  %v792_v37 = vpop.xlane.xlu1 %791 }
 0x330   :  { %2928 = vpow2.f32 %v840_v19  ;;  %v818_v59 = vsub.f32 %v754_v21, %v792_v37  ;;  %v51_v21 = vmul.f32 %v2982_v44, %v2982_v44  ;;  %v91_v30 = vsel %vm24_vm0, %v57_v54, 0.0 }
 0x331   :  { %v4588_v24 = vpop.eup %2918  ;;  %v842_v18 = vmul.f32 1.442695, %v817_v58  ;;  %v2413_v54 = vsel %vm2367_vm1, %v3000_v31, 0.0 }
 0x332   :  { %v865_v45 = vsel %vm24_vm0, %v4588_v24, 0.0  ;;  %v4592_v12 = vpop.eup %2920  ;;  %v795_v56 = vpop.xlane.xlu0 %794  ;;  %v844_v23 = vmul.f32 1.442695, %v818_v59  ;;  %v73_v42 = vsel %vm24_vm0, %v51_v21, 0.0  ;;  %v58_v59 = vmul.f32 %v2989_v38, %v2989_v38 }
 0x333   :  { %26 = vadd.xlane.f32.xlu1 %v25_v9  ;;  %866 = vadd.xlane.f32.xlu0 %v865_v45  ;;  %v868_v63 = vsel %vm24_vm0, %v4592_v12, 0.0  ;;  %2930 = vpow2.f32 %v842_v18  ;;  %v819_v61 = vsub.f32 %v755_v41, %v795_v56  ;;  %v798_v33 = vpop.xlane.xlu1 %797  ;;  %v82_v9 = vsel %vm24_vm0, %v54_v10, 0.0  ;;  %v2990_v56 = vld [vmem:[%s4860_s4 + $0x90] sm:$0xff] }
 0x334   :  { %2932 = vpow2.f32 %v844_v23  ;;  %v820_v29 = vsub.f32 %v756_v17, %v798_v33  ;;  %v53_v17 = vmul.f32 %v2984_v26, %v2984_v26  ;;  %v2991_v23 = vld [vmem:[%s4856_s0 + $0x58] sm:$0xff]  ;;  %v5056_v33 = vld [vmem:[#allocation31_spill] sm:$0xff] }
 0x335   :  { %v4600_v2 = vpop.eup %2922  ;;  %v846_v41 = vmul.f32 1.442695, %v819_v61  ;;  %v59_v61 = vmul.f32 %v2991_v23, %v2991_v23  ;;  %v2997_v10 = vld [vmem:[%s4856_s0 + $0x70] sm:$0xff] }
 0x336   :  { %v871_v39 = vsel %vm24_vm0, %v4600_v2, 0.0  ;;  %v4612_v8 = vpop.eup %2924  ;;  %v801_v55 = vpop.xlane.xlu0 %800  ;;  %v848_v53 = vmul.f32 1.442695, %v820_v29  ;;  %v79_v22 = vsel %vm24_vm0, %v53_v17, 0.0  ;;  %v2993_v29 = vld [vmem:[%s4856_s0 + $0x68] sm:$0xff] }
 0x337   :  { %65 = vadd.xlane.f32.xlu1 %v64_v60  ;;  %869 = vadd.xlane.f32.xlu0 %v868_v63  ;;  %v874_v0 = vsel %vm24_vm0, %v4612_v8, 0.0  ;;  %2934 = vpow2.f32 %v846_v41  ;;  %v821_v40 = vsub.f32 %v757_v28, %v801_v55  ;;  %v804_v46 = vpop.xlane.xlu1 %803  ;;  %v61_v41 = vmul.f32 %v2993_v29, %v2993_v29  ;;  %v2994_v55 = vld [vmem:[%s4856_s0 + $0x60] sm:$0xff] }
 0x338   :  { %2936 = vpow2.f32 %v848_v53  ;;  %v822_v36 = vsub.f32 %v758_v48, %v804_v46  ;;  %v55_v48 = vmul.f32 %v2986_v34, %v2986_v34  ;;  %v2996_v46 = vld [vmem:[%s4856_s0 + $0x78] sm:$0xff] }
 0x339   :  { %v4622_v14 = vpop.eup %2926  ;;  %v850_v28 = vmul.f32 1.442695, %v821_v40  ;;  %v2995_v40 = vld [vmem:[%s4860_s4 + $0xa0] sm:$0xff]  ;;  %v103_v17 = vsel %vm24_vm0, %v61_v41, 0.0 }
 0x33a   :  { %v877_v7 = vsel %vm24_vm0, %v4622_v14, 0.0  ;;  %v4632_v27 = vpop.eup %2928  ;;  %v807_v15 = vpop.xlane.xlu0 %806  ;;  %v852_v3 = vmul.f32 1.442695, %v822_v36  ;;  %v85_v45 = vsel %vm24_vm0, %v55_v48, 0.0  ;;  %v2407_v26 = vsel %vm2367_vm1, %v2995_v40, 0.0  ;;  %v3006_v40 = vld [vmem:[%s4860_s4 + $0xe8] sm:$0xff] }
 0x33b   :  { %872 = vadd.xlane.f32.xlu1 %v871_v39  ;;  %68 = vadd.xlane.f32.xlu0 %v67_v4  ;;  %v880_v52 = vsel %vm24_vm0, %v4632_v27, 0.0  ;;  %2938 = vpow2.f32 %v850_v28  ;;  %v823_v51 = vsub.f32 %v759_v47, %v807_v15  ;;  %v56_v47 = vmul.f32 %v2987_v16, %v2987_v16  ;;  %v2631_v28 = vpop.f32.mrb[32].mxu1 }
 0x33c   :  { %2940 = vpow2.f32 %v852_v3  ;;  %v2403_v39 = vsel %vm2367_vm1, %v2990_v56, 0.0  ;;  %v62_v36 = vmul.f32 %v2997_v10, %v2997_v10  ;;  %v2632_v15 = vpop.f32.mrb[33].mxu1  ;;  %v3002_v56 = vld [vmem:[%s4860_s4 + $0xc8] sm:$0xff]  ;;  %v3008_v10 = vld [vmem:[%s4860_s4 + $0xf8] sm:$0xff] }
 0x33d   :  { %v4642_v13 = vpop.eup %2930  ;;  %v854_v20 = vmul.f32 1.442695, %v823_v51  ;;  %v88_v58 = vsel %vm24_vm0, %v56_v47, 0.0  ;;  %v2633_v51 = vadd.f32 %v2632_v15, %v2631_v28 }
 0x33e   :  { %v883_v5 = vsel %vm24_vm0, %v4642_v13, 0.0  ;;  %v4652_v6 = vpop.eup %2932  ;;  %v106_v34 = vsel %vm24_vm0, %v62_v36, 0.0  ;;  %v2429_v36 = vsel %vm2367_vm1, %v3008_v10, 0.0 }
 0x33f   :  { %875 = vadd.xlane.f32.xlu1 %v874_v0  ;;  %71 = vadd.xlane.f32.xlu0 %v70_v11  ;;  %v886_v49 = vsel %vm24_vm0, %v4652_v6, 0.0  ;;  %2942 = vpow2.f32 %v854_v20  ;;  %v94_v11 = vsel %vm24_vm0, %v58_v59, 0.0  ;;  %v2404_v0 = vadd.f32 %v2403_v39, %v5056_v33 }
 0x340   :  { %v2336_v48 = vsel %vm2335_vm4, %v2633_v51, 0.0  ;;  %v2417_v39 = vsel %vm2367_vm1, %v3002_v56, 0.0 }
 0x341   :  { %v4662_v43 = vpop.eup %2934  ;;  %v2406_v53 = vadd.f32 %v2405_v50, %v2404_v0  ;;  %v2337_v20 = vrot.slane %v2336_v48, 4  ;;  %v3004_v50 = vld [vmem:[%s4860_s4 + $0xd8] sm:$0xff] }
 0x342   :  { %v889_v60 = vsel %vm24_vm0, %v4662_v43, 0.0  ;;  %v4670_v19 = vpop.eup %2936  ;;  %v2421_v29 = vsel %vm2367_vm1, %v3004_v50, 0.0 }
 0x343   :  { %878 = vadd.xlane.f32.xlu1 %v877_v7  ;;  %74 = vadd.xlane.f32.xlu0 %v73_v42  ;;  %v892_v37 = vsel %vm24_vm0, %v4670_v19, 0.0  ;;  %v97_v42 = vsel %vm24_vm0, %v59_v61, 0.0  ;;  %v60_v7 = vmul.f32 %v2994_v55, %v2994_v55  ;;  %v2338_v47 = vadd.f32 %v2337_v20, %v2336_v48  ;;  %v5058_v20 = vld [vmem:[#allocation10_spill] sm:$0xff] }
 0x345   :  { %v4678_v63 = vpop.eup %2938  ;;  %v100_v57 = vsel %vm24_vm0, %v60_v7, 0.0  ;;  %v3005_v7 = vld [vmem:[%s4860_s4 + $0xe0] sm:$0xff] }
 0x346   :  { %v895_v18 = vsel %vm24_vm0, %v4678_v63, 0.0  ;;  %v4686_v4 = vpop.eup %2940 }
 0x347   :  { %881 = vadd.xlane.f32.xlu1 %v880_v52  ;;  %77 = vadd.xlane.f32.xlu0 %v76_v25  ;;  %v898_v44 = vsel %vm24_vm0, %v4686_v4, 0.0  ;;  %v63_v52 = vmul.f32 %v2996_v46, %v2996_v46  ;;  %v3007_v46 = vld [vmem:[%s4860_s4 + $0xf0] sm:$0xff] }
 0x349   :  { %v4698_v21 = vpop.eup %2942  ;;  %v109_v3 = vsel %vm24_vm0, %v63_v52, 0.0  ;;  %v2427_v52 = vsel %vm2367_vm1, %v3007_v46, 0.0 }
 0x34a   :  { %v901_v25 = vsel %vm24_vm0, %v4698_v21, 0.0 }
 0x34b   :  { %884 = vadd.xlane.f32.xlu1 %v883_v5  ;;  %80 = vadd.xlane.f32.xlu0 %v79_v22  ;;  %v2408_v22 = vadd.f32 %v2407_v26, %v2406_v53  ;;  %v2998_v5 = vld [vmem:[%s4860_s4 + $0xa8] sm:$0xff]  ;;  %v2425_v26 = vsel %vm2367_vm1, %v3006_v40, 0.0 }
 0x34f   :  { %887 = vadd.xlane.f32.xlu1 %v886_v49  ;;  %83 = vadd.xlane.f32.xlu0 %v82_v9  ;;  %v2409_v9 = vsel %vm2367_vm1, %v2998_v5, 0.0 }
 0x350   :  { %v2410_v49 = vadd.f32 %v2409_v9, %v2408_v22 }
 0x353   :  { %890 = vadd.xlane.f32.xlu1 %v889_v60  ;;  %86 = vadd.xlane.f32.xlu0 %v85_v45  ;;  %v2999_v45 = vld [vmem:[%s4860_s4 + $0xb0] sm:$0xff] }
 0x354   :  { %v2411_v16 = vsel %vm2367_vm1, %v2999_v45, 0.0  ;;  %v344_v45 = vmul.f32 2.0, %v5058_v20 }
 0x355   :  { %v2412_v60 = vadd.f32 %v2411_v16, %v2410_v49 }
 0x357   :  { %893 = vadd.xlane.f32.xlu1 %v892_v37  ;;  %89 = vadd.xlane.f32.xlu0 %v88_v58  ;;  %v2339_v58 = vrot.slane %v2338_v47, 2 }
 0x359   :  { %v2340_v37 = vadd.f32 %v2339_v58, %v2338_v47 }
 0x35b   :  { %896 = vadd.xlane.f32.xlu1 %v895_v18  ;;  %92 = vadd.xlane.f32.xlu0 %v91_v30  ;;  %v3001_v30 = vld [vmem:[%s4860_s4 + $0xc0] sm:$0xff]  ;;  %v2341_v59 = vrot.slane %v2340_v37, 1  ;;  %v2414_v18 = vadd.f32 %v2413_v54, %v2412_v60 }
 0x35c   :  { %v2415_v38 = vsel %vm2367_vm1, %v3001_v30, 0.0 }
 0x35d   :  { %v2342_v23 = vadd.f32 %v2341_v59, %v2340_v37  ;;  %v2416_v61 = vadd.f32 %v2415_v38, %v2414_v18  ;;  %v5059_v37 = vld [vmem:[#allocation9_spill] sm:$0xff] }
 0x35e   :  { %v345_v30 = vmul.f32 2.0, %v5059_v37 }
 0x35f   :  { %899 = vadd.xlane.f32.xlu1 %v898_v44  ;;  %95 = vadd.xlane.f32.xlu0 %v94_v11  ;;  %v2355_v11 = vmul.f32 %v2633_v51, %v2633_v51  ;;  %v3003_v44 = vld [vmem:[%s4860_s4 + $0xd0] sm:$0xff]  ;;  %v2343_v0 = vmul.f32 %v2342_v23, %v2342_v23  ;;  %v2418_v35 = vadd.f32 %v2417_v39, %v2416_v61  ;;  %v5057_v51 = vld [vmem:[#allocation6_spill] sm:$0xff]  ;;  %v5060_v23 = vld [vmem:[#allocation13_spill] sm:$0xff] }
 0x360   :  { %v2419_v33 = vsel %vm2367_vm1, %v3003_v44, 0.0  ;;  %v346_v61 = vmul.f32 2.0, %v5060_v23 }
 0x361   :  { %v4758_v41 = vsel %vm2335_vm4, %v2355_v11, 0.0  ;;  %v2420_v55 = vadd.f32 %v2419_v33, %v2418_v35 }
 0x363   :  { %902 = vadd.xlane.f32.xlu1 %v901_v25  ;;  %98 = vadd.xlane.f32.xlu0 %v97_v42  ;;  %v2345_v42 = vsel %vm2344_vm5, %v2343_v0, 0.0  ;;  %v2423_v25 = vsel %vm2367_vm1, %v3005_v7, 0.0  ;;  %v2422_v53 = vadd.f32 %v2421_v29, %v2420_v55 }
 0x367   :  { %104 = vadd.xlane.f32.xlu1 %v103_v17  ;;  %101 = vadd.xlane.f32.xlu0 %v100_v57  ;;  %v2424_v17 = vadd.f32 %v2423_v25, %v2422_v53  ;;  %v5061_v25 = vld [vmem:[#allocation12_spill] sm:$0xff] }
 0x368   :  { %v347_v53 = vmul.f32 2.0, %v5061_v25 }
 0x369   :  { %v2426_v57 = vadd.f32 %v2425_v26, %v2424_v17 }
 0x36b   :  { %110 = vadd.xlane.f32.xlu1 %v109_v3  ;;  %107 = vadd.xlane.f32.xlu0 %v106_v34  ;;  %v2428_v28 = vadd.f32 %v2427_v52, %v2426_v57 }
 0x36d   :  { %v2430_v22 = vadd.f32 %v2429_v36, %v2428_v28 }
 0x36f   :  { %2346 = vadd.xlane.f32.xlu1 %v2345_v42 }
 0x373   :  { %2431 = vadd.xlane.f32.xlu1 %v2430_v22  ;;  %v5062_v22 = vld [vmem:[#allocation40_spill] sm:$0xff] }
 0x3b8   :  { %v858_v15 = vpop.xlane.xlu1 %857 }
 0x3b9   :  { %v861_v9 = vpop.xlane.xlu0 %860  ;;  %2944 = vrcp.f32 %v858_v15  ;;  %v348_v15 = vmul.f32 2.0, %v5062_v22 }
 0x3ba   :  { %2946 = vrcp.f32 %v861_v9 }
 0x3bc   :  { %v864_v5 = vpop.xlane.xlu1 %863 }
 0x3bd   :  { %2948 = vrcp.f32 %v864_v5 }
 0x3c0   :  { %v27_v3 = vpop.xlane.xlu1 %26  ;;  %v867_v48 = vpop.xlane.xlu0 %866 }
 0x3c1   :  { %v4777_v34 = vrot.slane %v27_v3, %v5057_v51  ;;  %2950 = vrcp.f32 %v867_v48 }
 0x3c3   :  { %v2945_v31 = vpop.eup %2944 }
 0x3c4   :  { %v66_v49 = vpop.xlane.xlu1 %65  ;;  %v870_v47 = vpop.xlane.xlu0 %869  ;;  %v920_v56 = vmul.f32 %v2945_v31, %v4563_v62 }
 0x3c5   :  { %v328_v16 = vadd.f32 %v4777_v34, %v66_v49  ;;  %v2947_v18 = vpop.eup %2946  ;;  %2952 = vrcp.f32 %v870_v47  ;;  %v5063_v47 = vld [vmem:[#allocation16_spill] sm:$0xff] }
 0x3c6   :  { %v921_v35 = vmul.f32 %v2947_v18, %v4567_v32 }
 0x3c7   :  { %v360_v60 = vsub.f32 %v328_v16, %v344_v45  ;;  %v2949_v33 = vpop.eup %2948 }
 0x3c8   :  { %v873_v58 = vpop.xlane.xlu1 %872  ;;  %v69_v54 = vpop.xlane.xlu0 %68  ;;  %v922_v62 = vmul.f32 %v2949_v33, %v4576_v1 }
 0x3c9   :  { %v376_v38 = vmax.f32 %v360_v60, 0.0  ;;  %v329_v59 = vadd.f32 %v4777_v34, %v69_v54  ;;  %2954 = vrcp.f32 %v873_v58  ;;  %v349_v60 = vmul.f32 2.0, %v5063_v47 }
 0x3cb   :  { %v361_v39 = vsub.f32 %v329_v59, %v345_v30  ;;  %v936_v0 = vmul.f32 %v920_v56, %v376_v38  ;;  %v2951_v32 = vpop.eup %2950 }
 0x3cc   :  { %v876_v11 = vpop.xlane.xlu1 %875  ;;  %v72_v44 = vpop.xlane.xlu0 %71  ;;  %v923_v1 = vmul.f32 %v2951_v32, %v4588_v24 }
 0x3cd   :  { %v377_v50 = vmax.f32 %v361_v39, 0.0  ;;  %v330_v29 = vadd.f32 %v4777_v34, %v72_v44  ;;  %v952_v26 = vsel %vm24_vm0, %v936_v0, 0.0  ;;  %2956 = vrcp.f32 %v876_v11  ;;  %v5064_v39 = vld [vmem:[#allocation42_spill] sm:$0xff] }
 0x3ce   :  { %v350_v11 = vmul.f32 2.0, %v5064_v39 }
 0x3cf   :  { %v937_v42 = vmul.f32 %v921_v35, %v377_v50  ;;  %v362_v55 = vsub.f32 %v330_v29, %v346_v61  ;;  %v2953_v48 = vpop.eup %2952 }
 0x3d0   :  { %v879_v7 = vpop.xlane.xlu1 %878  ;;  %v75_v40 = vpop.xlane.xlu0 %74  ;;  %v924_v54 = vmul.f32 %v2953_v48, %v4592_v12  ;;  %v5067_v48 = vld [vmem:[#allocation43_spill] sm:$0xff] }
 0x3d1   :  { %v953_v17 = vsel %vm24_vm0, %v937_v42, 0.0  ;;  %v378_v46 = vmax.f32 %v362_v55, 0.0  ;;  %v331_v52 = vadd.f32 %v4777_v34, %v75_v40  ;;  %2958 = vrcp.f32 %v879_v7  ;;  %v5065_v55 = vld [vmem:[#allocation41_spill] sm:$0xff] }
 0x3d2   :  { %v954_v57 = vadd.f32 %v953_v17, %v952_v26  ;;  %v351_v7 = vmul.f32 2.0, %v5065_v55 }
 0x3d3   :  { %v938_v10 = vmul.f32 %v922_v62, %v378_v46  ;;  %v363_v36 = vsub.f32 %v331_v52, %v347_v53  ;;  %v2955_v24 = vpop.eup %2954 }
 0x3d4   :  { %v882_v28 = vpop.xlane.xlu1 %881  ;;  %v78_v5 = vpop.xlane.xlu0 %77  ;;  %v925_v44 = vmul.f32 %v2955_v24, %v4600_v2 }
 0x3d5   :  { %v955_v9 = vsel %vm24_vm0, %v938_v10, 0.0  ;;  %v379_v3 = vmax.f32 %v363_v36, 0.0  ;;  %v332_v51 = vadd.f32 %v4777_v34, %v78_v5  ;;  %2960 = vrcp.f32 %v882_v28 }
 0x3d6   :  { %v956_v49 = vadd.f32 %v955_v9, %v954_v57  ;;  %v5066_v57 = vld [vmem:[#allocation44_spill] sm:$0xff] }
 0x3d7   :  { %v939_v20 = vmul.f32 %v923_v1, %v379_v3  ;;  %v364_v45 = vsub.f32 %v332_v51, %v348_v15  ;;  %v2957_v12 = vpop.eup %2956  ;;  %v352_v10 = vmul.f32 2.0, %v5066_v57 }
 0x3d8   :  { %v885_v16 = vpop.xlane.xlu1 %884  ;;  %v81_v58 = vpop.xlane.xlu0 %80  ;;  %v926_v62 = vmul.f32 %v2957_v12, %v4612_v8 }
 0x3d9   :  { %v957_v31 = vsel %vm24_vm0, %v939_v20, 0.0  ;;  %v380_v37 = vmax.f32 %v364_v45, 0.0  ;;  %v333_v30 = vadd.f32 %v4777_v34, %v81_v58  ;;  %2962 = vrcp.f32 %v885_v16 }
 0x3da   :  { %v958_v38 = vadd.f32 %v957_v31, %v956_v49  ;;  %v353_v49 = vmul.f32 2.0, %v5067_v48 }
 0x3db   :  { %v940_v59 = vmul.f32 %v924_v54, %v380_v37  ;;  %v365_v18 = vsub.f32 %v333_v30, %v349_v60  ;;  %v2959_v2 = vpop.eup %2958  ;;  %v5068_v30 = vld [vmem:[#allocation46_spill] sm:$0xff] }
 0x3dc   :  { %v888_v56 = vpop.xlane.xlu1 %887  ;;  %v84_v23 = vpop.xlane.xlu0 %83  ;;  %v927_v22 = vmul.f32 %v2959_v2, %v4622_v14  ;;  %v354_v24 = vmul.f32 2.0, %v5068_v30 }
 0x3dd   :  { %v959_v61 = vsel %vm24_vm0, %v940_v59, 0.0  ;;  %v381_v33 = vmax.f32 %v365_v18, 0.0  ;;  %v334_v0 = vadd.f32 %v4777_v34, %v84_v23  ;;  %2964 = vrcp.f32 %v888_v56 }
 0x3de   :  { %v960_v35 = vadd.f32 %v959_v61, %v958_v38 }
 0x3df   :  { %v941_v50 = vmul.f32 %v925_v44, %v381_v33  ;;  %v366_v29 = vsub.f32 %v334_v0, %v350_v11  ;;  %v2961_v8 = vpop.eup %2960  ;;  %v5069_v33 = vld [vmem:[#allocation45_spill] sm:$0xff] }
 0x3e0   :  { %v891_v42 = vpop.xlane.xlu1 %890  ;;  %v87_v25 = vpop.xlane.xlu0 %86  ;;  %v928_v16 = vmul.f32 %v2961_v8, %v4632_v27  ;;  %v355_v0 = vmul.f32 2.0, %v5069_v33 }
 0x3e1   :  { %v961_v53 = vsel %vm24_vm0, %v941_v50, 0.0  ;;  %v382_v40 = vmax.f32 %v366_v29, 0.0  ;;  %v335_v26 = vadd.f32 %v4777_v34, %v87_v25  ;;  %2966 = vrcp.f32 %v891_v42 }
 0x3e2   :  { %v962_v17 = vadd.f32 %v961_v53, %v960_v35 }
 0x3e3   :  { %v942_v46 = vmul.f32 %v926_v62, %v382_v40  ;;  %v367_v52 = vsub.f32 %v335_v26, %v351_v7  ;;  %v2963_v14 = vpop.eup %2962  ;;  %v5070_v62 = vld [vmem:[#allocation47_spill] sm:$0xff]  ;;  %v5071_v26 = vld [vmem:[#allocation48_spill] sm:$0xff] }
 0x3e4   :  { %v894_v32 = vpop.xlane.xlu1 %893  ;;  %v90_v36 = vpop.xlane.xlu0 %89  ;;  %v929_v18 = vmul.f32 %v2963_v14, %v4642_v13  ;;  %v357_v40 = vmul.f32 2.0, %v5070_v62  ;;  %v356_v2 = vmul.f32 2.0, %v5071_v26 }
 0x3e5   :  { %v963_v28 = vsel %vm24_vm0, %v942_v46, 0.0  ;;  %v383_v15 = vmax.f32 %v367_v52, 0.0  ;;  %v336_v5 = vadd.f32 %v4777_v34, %v90_v36  ;;  %2968 = vrcp.f32 %v894_v32 }
 0x3e6   :  { %v964_v9 = vadd.f32 %v963_v28, %v962_v17 }
 0x3e7   :  { %v943_v1 = vmul.f32 %v927_v22, %v383_v15  ;;  %v368_v3 = vsub.f32 %v336_v5, %v352_v10  ;;  %v2965_v39 = vpop.eup %2964  ;;  %v5072_v15 = vld [vmem:[#allocation49_spill] sm:$0xff] }
 0x3e8   :  { %v897_v51 = vpop.xlane.xlu1 %896  ;;  %v93_v20 = vpop.xlane.xlu0 %92  ;;  %v930_v50 = vmul.f32 %v2965_v39, %v4652_v6  ;;  %v359_v5 = vmul.f32 2.0, %v5072_v15 }
 0x3e9   :  { %v965_v45 = vsel %vm24_vm0, %v943_v1, 0.0  ;;  %v384_v47 = vmax.f32 %v368_v3, 0.0  ;;  %v337_v60 = vadd.f32 %v4777_v34, %v93_v20  ;;  %2970 = vrcp.f32 %v897_v51  ;;  %v5073_v3 = vld [vmem:[#allocation50_spill] sm:$0xff] }
 0x3ea   :  { %v966_v58 = vadd.f32 %v965_v45, %v964_v9  ;;  %v358_v51 = vmul.f32 2.0, %v5073_v3 }
 0x3eb   :  { %v944_v31 = vmul.f32 %v928_v16, %v384_v47  ;;  %v369_v54 = vsub.f32 %v337_v60, %v353_v49  ;;  %v2967_v42 = vpop.eup %2966 }
 0x3ec   :  { %v900_v37 = vpop.xlane.xlu1 %899  ;;  %v96_v38 = vpop.xlane.xlu0 %95  ;;  %v931_v6 = vmul.f32 %v2967_v42, %v4662_v43 }
 0x3ed   :  { %v967_v59 = vsel %vm24_vm0, %v944_v31, 0.0  ;;  %v385_v56 = vmax.f32 %v369_v54, 0.0  ;;  %v338_v27 = vadd.f32 %v4777_v34, %v96_v38  ;;  %2972 = vrcp.f32 %v900_v37 }
 0x3ee   :  { %v968_v11 = vadd.f32 %v967_v59, %v966_v58 }
 0x3ef   :  { %v945_v23 = vmul.f32 %v929_v18, %v385_v56  ;;  %v370_v61 = vsub.f32 %v338_v27, %v354_v24  ;;  %v2969_v52 = vpop.eup %2968 }
 0x3f0   :  { %v903_v44 = vpop.xlane.xlu1 %902  ;;  %v99_v12 = vpop.xlane.xlu0 %98  ;;  %v932_v49 = vmul.f32 %v2969_v52, %v4670_v19 }
 0x3f1   :  { %2974 = vrcp.f32 %v903_v44  ;;  %v969_v35 = vsel %vm24_vm0, %v945_v23, 0.0  ;;  %v386_v29 = vmax.f32 %v370_v61, 0.0  ;;  %v339_v13 = vadd.f32 %v4777_v34, %v99_v12 }
 0x3f2   :  { %v970_v55 = vadd.f32 %v969_v35, %v968_v11 }
 0x3f3   :  { %v946_v7 = vmul.f32 %v930_v50, %v386_v29  ;;  %v371_v25 = vsub.f32 %v339_v13, %v355_v0  ;;  %v2971_v36 = vpop.eup %2970 }
 0x3f4   :  { %v105_v53 = vpop.xlane.xlu1 %104  ;;  %v102_v46 = vpop.xlane.xlu0 %101  ;;  %v933_v47 = vmul.f32 %v2971_v36, %v4678_v63 }
 0x3f5   :  { %v341_v17 = vadd.f32 %v4777_v34, %v105_v53  ;;  %v971_v32 = vsel %vm24_vm0, %v946_v7, 0.0  ;;  %v387_v57 = vmax.f32 %v371_v25, 0.0  ;;  %v340_v10 = vadd.f32 %v4777_v34, %v102_v46 }
 0x3f6   :  { %v972_v28 = vadd.f32 %v971_v32, %v970_v55 }
 0x3f7   :  { %v373_v22 = vsub.f32 %v341_v17, %v357_v40  ;;  %v947_v8 = vmul.f32 %v931_v6, %v387_v57  ;;  %v372_v9 = vsub.f32 %v340_v10, %v356_v2  ;;  %v2973_v43 = vpop.eup %2972 }
 0x3f8   :  { %v111_v1 = vpop.xlane.xlu1 %110  ;;  %v108_v45 = vpop.xlane.xlu0 %107  ;;  %v934_v18 = vmul.f32 %v2973_v43, %v4686_v4 }
 0x3f9   :  { %v389_v48 = vmax.f32 %v373_v22, 0.0  ;;  %v343_v20 = vadd.f32 %v4777_v34, %v111_v1  ;;  %v973_v16 = vsel %vm24_vm0, %v947_v8, 0.0  ;;  %v388_v60 = vmax.f32 %v372_v9, 0.0 }
 0x3fa   :  { %v342_v14 = vadd.f32 %v4777_v34, %v108_v45  ;;  %v974_v31 = vadd.f32 %v973_v16, %v972_v28 }
 0x3fb   :  { %v2975_v58 = vpop.eup %2974  ;;  %v375_v54 = vsub.f32 %v343_v20, %v359_v5  ;;  %v949_v37 = vmul.f32 %v933_v47, %v389_v48  ;;  %v948_v30 = vmul.f32 %v932_v49, %v388_v60 }
 0x3fc   :  { %v935_v24 = vmul.f32 %v2975_v58, %v4698_v21  ;;  %v374_v38 = vsub.f32 %v342_v14, %v358_v51  ;;  %v2347_v21 = vpop.xlane.xlu1 %2346 }
 0x3fd   :  { %v391_v19 = vmax.f32 %v375_v54, 0.0  ;;  %v975_v59 = vsel %vm24_vm0, %v948_v30, 0.0  ;;  %v977_v63 = vsel %vm24_vm0, %v949_v37, 0.0  ;;  %v2348_v0 = vrot.slane %v2347_v21, 4 }
 0x3fe   :  { %v390_v56 = vmax.f32 %v374_v38, 0.0  ;;  %v976_v27 = vadd.f32 %v975_v59, %v974_v31 }
 0x3ff   :  { %v951_v39 = vmul.f32 %v935_v24, %v391_v19  ;;  %v2349_v4 = vadd.f32 %v2348_v0, %v2347_v21 }
 0x400   :  { %v950_v11 = vmul.f32 %v934_v18, %v390_v56  ;;  %v978_v34 = vadd.f32 %v977_v63, %v976_v27  ;;  %v2432_v12 = vpop.xlane.xlu1 %2431 }
 0x401   :  { %v981_v44 = vsel %vm24_vm0, %v951_v39, 0.0  ;;  %v2433_v35 = vrot.slane %v2432_v12, 4  ;;  %v2350_v50 = vrot.slane %v2349_v4, 2 }
 0x402   :  { %v979_v23 = vsel %vm24_vm0, %v950_v11, 0.0 }
 0x403   :  { %v980_v61 = vadd.f32 %v979_v23, %v978_v34  ;;  %v2434_v29 = vadd.f32 %v2433_v35, %v2432_v12  ;;  %v2351_v53 = vadd.f32 %v2350_v50, %v2349_v4 }
 0x405   :  { %v982_v33 = vadd.f32 %v981_v44, %v980_v61  ;;  %v2435_v7 = vrot.slane %v2434_v29, 2  ;;  %v2352_v46 = vrot.slane %v2351_v53, 1 }
 0x407   :  { %983 = vadd.xlane.f32.xlu0 %v982_v33  ;;  %v2436_v17 = vadd.f32 %v2435_v7, %v2434_v29  ;;  %v2353_v57 = vadd.f32 %v2352_v46, %v2351_v53 }
 0x409   :  { %v2437_v10 = vrot.slane %v2436_v17, 1 }
 0x40b   :  { %2357 = vadd.xlane.f32.xlu0 %v4758_v41  ;;  %v2438_v22 = vadd.f32 %v2437_v10, %v2436_v17 }
 0x494   :  { %v984_v13 = vpop.xlane.xlu0 %983 }
 0x495   :  { %v985_v42 = vrot.slane %v984_v13, 4 }
 0x497   :  { %v986_v55 = vadd.f32 %v985_v42, %v984_v13 }
 0x498   :  { %v2358_v25 = vpop.xlane.xlu0 %2357 }
 0x499   :  { %v987_v62 = vrot.slane %v986_v55, 2  ;;  %v2359_v40 = vrot.slane %v2358_v25, 4 }
 0x49b   :  { %v2360_v26 = vadd.f32 %v2359_v40, %v2358_v25  ;;  %v988_v2 = vadd.f32 %v987_v62, %v986_v55 }
 0x49d   :  { %v2361_v41 = vrot.slane %v2360_v26, 2  ;;  %v989_v52 = vrot.slane %v988_v2, 1 }
 0x49f   :  { %v2362_v32 = vadd.f32 %v2361_v41, %v2360_v26  ;;  %v990_v6 = vadd.f32 %v989_v52, %v988_v2 }
 0x4a1   :  { %2768 = vpush %v990_v6  ;;  %v2363_v36 = vrot.slane %v2362_v32, 1 }
 0x4a2   :  { %2770 = vpush %v2353_v57 }
 0x4a3   :  { %v2364_v28 = vadd.f32 %v2363_v36, %v2362_v32 }
 0x4a5   :  { %2772 = vpush %v2364_v28 }
 0x4a6   :  { %2774 = vpush %v2438_v22 }
 0x4d2   :  { %s2769_s4 = spop %2768 }
 0x4d3   :  { %s992_s6 = smul.f32 0.0009765625, %s2769_s4  ;;  %s2771_s7 = spop %2770 }
 0x4d5   :  { %994 = sst [smem:[#allocation2]] %s992_s6 }
 0x4d6   :  { %s2773_s8 = spop %2772 }
 0x4d7   :  { %s2775_s9 = spop %2774  ;;  %s2366_s1 = ssub.f32 %s2771_s7, %s2773_s8 }
 0x4d8   :  { %s2440_s10 = smul.f32 %s2775_s9, %s2775_s9 }
 0x4da   :  { %s2441_s12 = smax.f32 %s3023_s11, %s2440_s10 }
 0x4db   :  { %v2442_v15 = vstv %s2441_s12 }
 0x4dc   :  { %2976 = vrcp.f32 %v2442_v15 }
 0x4e6   :  { %v2977_v5 = vpop.eup %2976 }
 0x4e7   :  { %2776 = vpush %v2977_v5 }
 0x518   :  { %s2777_s13 = spop %2776 }
 0x519   :  { %s2445_s0 = smul.f32 %s2777_s13, %s2366_s1 }
 0x51b   :  { %2447 = sst [smem:[#allocation2 + $0x1]] %s2445_s0 }
 0x51c   :  { %3018 = shalt.err (!%p3015_p2)
}
 0x51d   :  { %s3024_s21 = smov [#allocation2]  }
 0x51e   :  { %2455 = dma.smem_to_hbm %s3024_s21, 16, %s4861_s5, [#allocation3]  }
 0x51f   :  { %3019 = dma.done.wait [#allocation3], 16  }
 0x520   :  { %3020 = vsyncadd [#allocation3], 4294967280 }
 0x521   :  { %2459 = sfence }
 0x522   :  { %2460 = vsyncpa [#allocation3], 1 }

</bundles_post_ra>
